<compile_context>
chip_gen: v7x
topology: tpu7x:2x2x1
jax: 0.10.0
libtpu: 0.0.40
codegen_flags: <defaults>
</compile_context>

<pallas_src>
import jax
import jax.numpy as jnp
from jax import lax
from jax.experimental import pallas as pl
from jax.experimental.pallas import tpu as pltpu

KH = KW = 3          # conv kernel size
POOL = 2             # downscale factor
EPS = 1e-5           # BatchNorm eps (PyTorch default)


def _zero_halo(pad_ref):
    """Zero only the 1-pixel halo border of a padded scratch tile.

    The interior is fully overwritten every grid step, so re-zeroing the whole
    tile (two full store passes / step previously) is wasted store bandwidth.
    Border zeroing is repeated every step (not gated on program_id == 0) so it
    stays correct when the 'parallel' batch axis is sharded across TensorCores.
    """
    Hpad, Wpad, C = pad_ref.shape
    zrow = jnp.zeros((1, Wpad, C), pad_ref.dtype)
    pad_ref[0:1, :, :] = zrow
    pad_ref[Hpad - 1:Hpad, :, :] = zrow
    zcol = jnp.zeros((Hpad, 1, C), pad_ref.dtype)
    pad_ref[:, 0:1, :] = zcol
    pad_ref[:, Wpad - 1:Wpad, :] = zcol


def _conv3x3_bn_relu(pad_ref, w_ref, s_ref, b_ref):
    """3x3 'SAME' conv (9 shifted matmuls) + folded eval-BN + ReLU.

    Matmul operands are bf16 (MXU-native rate), accumulation is f32.  Two
    independent accumulators break the serial add chain after each MXU pop.
    """
    Hp = pad_ref.shape[0] - 2
    Wp = pad_ref.shape[1] - 2
    Cin = pad_ref.shape[2]
    Cout = w_ref.shape[-1]

    acc_even = jnp.zeros((Hp * Wp, Cout), jnp.float32)
    acc_odd = jnp.zeros((Hp * Wp, Cout), jnp.float32)
    for k in range(KH * KW):
        dy, dx = divmod(k, KW)
        win = pad_ref[dy:dy + Hp, dx:dx + Wp, :].reshape(Hp * Wp, Cin)
        part = jnp.dot(win.astype(jnp.bfloat16), w_ref[k],
                       preferred_element_type=jnp.float32)
        if k % 2 == 0:
            acc_even = acc_even + part
        else:
            acc_odd = acc_odd + part
    acc = acc_even + acc_odd
    return jnp.maximum(acc * s_ref[...] + b_ref[...], 0.0)   # [Hp*Wp, Cout] f32


def _down_block_kernel(x_ref, w1_ref, s1_ref, b1_ref, w2_ref, s2_ref, b2_ref,
                       out_ref, pad1_ref, pad2_ref):
    # x_ref:   [Hp, 2, Wp, 2*Cin] bf16 -- H pre-split into (Hp, 2) pool taps,
    #          the W pool tap folded next to channels (free wrapper reshape).
    # w*_ref:  [9, Cin/Cout, Cout] bf16 (tap k = dy*3 + dx)
    # s*/b*:   [1, Cout] f32 (conv bias + eval-mode BatchNorm folded)
    # out_ref: [Hp, Wp, Cout] f32
    Hp, _, Wp, C2 = x_ref.shape
    Cin = C2 // POOL
    Cout = out_ref.shape[-1]

    # ---- 2x2 max pool (stride 2), fused in-kernel (no HBM tap copy) ----
    x = x_ref[...]                                        # [Hp, 2, Wp, 2*Cin]
    mh = jnp.maximum(x[:, 0], x[:, 1])                    # max over H tap
    pooled = jnp.maximum(mh[:, :, :Cin], mh[:, :, Cin:])  # max over W tap

    # ---- conv1 3x3 pad=1  +  BN(eval, folded)  +  ReLU ----
    _zero_halo(pad1_ref)
    pad1_ref[1:Hp + 1, 1:Wp + 1, :] = pooled.astype(pad1_ref.dtype)
    h1 = _conv3x3_bn_relu(pad1_ref, w1_ref, s1_ref, b1_ref)   # [Hp*Wp, Cout]

    # ---- conv2 3x3 pad=1  +  BN(eval, folded)  +  ReLU ----
    _zero_halo(pad2_ref)
    pad2_ref[1:Hp + 1, 1:Wp + 1, :] = h1.reshape(Hp, Wp, Cout)
    h2 = _conv3x3_bn_relu(pad2_ref, w2_ref, s2_ref, b2_ref)

    out_ref[...] = h2.reshape(Hp, Wp, Cout).astype(out_ref.dtype)


def down_block_forward(x_nchw, fused_params):
    """x_nchw: [N, Cin, H, W] float32  ->  [N, Cout, H//2, W//2] float32."""
    w1k, s1, b1, w2k, s2, b2 = fused_params
    N, Cin, H, W = x_nchw.shape
    Cout = w1k.shape[-1]
    assert H % POOL == 0 and W % POOL == 0, "odd H/W not supported"
    Hp, Wp = H // POOL, W // POOL

    # Single layout pass: NCHW -> NHWC fused with the f32 -> bf16 cast.  The
    # reshape below is metadata-only: split H into (Hp, 2) and fold the W pool
    # tap onto the channel/lane axis, so the kernel reads the 2x2 taps directly
    # (the previous version materialized a full 4-tap copy of the input in HBM).
    x_nhwc = jnp.transpose(x_nchw, (0, 2, 3, 1)).astype(jnp.bfloat16)
    x_blk = x_nhwc.reshape(N, Hp, POOL, Wp, POOL * Cin)

    out_nhwc = pl.pallas_call(
        _down_block_kernel,
        out_shape=jax.ShapeDtypeStruct((N, Hp, Wp, Cout), jnp.float32),
        grid_spec=pltpu.PrefetchScalarGridSpec(
            num_scalar_prefetch=0,
            grid=(N,),
            in_specs=[
                pl.BlockSpec((None, Hp, POOL, Wp, POOL * Cin),
                             lambda n: (n, 0, 0, 0, 0)),
                pl.BlockSpec((KH * KW, Cin, Cout), lambda n: (0, 0, 0)),
                pl.BlockSpec((1, Cout), lambda n: (0, 0)),
                pl.BlockSpec((1, Cout), lambda n: (0, 0)),
                pl.BlockSpec((KH * KW, Cout, Cout), lambda n: (0, 0, 0)),
                pl.BlockSpec((1, Cout), lambda n: (0, 0)),
                pl.BlockSpec((1, Cout), lambda n: (0, 0)),
            ],
            out_specs=pl.BlockSpec((None, Hp, Wp, Cout),
                                   lambda n: (n, 0, 0, 0)),
            scratch_shapes=[
                # f32 (not bf16): the +/-1 shifted sublane reads/writes on a
                # packed dtype would need sub-sublane masked accesses; these
                # scratches stay on-chip so no HBM bandwidth is at stake.
                pltpu.VMEM((Hp + 2, Wp + 2, Cin), jnp.float32),
                pltpu.VMEM((Hp + 2, Wp + 2, Cout), jnp.float32),
            ],
        ),
        compiler_params=pltpu.CompilerParams(dimension_semantics=("parallel",)),
    )(x_blk, w1k, s1, b1, w2k, s2, b2)

    # Back to the module's NCHW interface (one small pass over the 4x-smaller
    # output; keeping NHWC end-to-end at the model level would drop it).
    return jnp.transpose(out_nhwc, (0, 3, 1, 2))


def init_params(key, cin, cout):
    """Deterministic synthetic params: conv weights (torch OIHW) + eval-mode BN."""
    ks = jax.random.split(key, 8)

    def uinit(k, shape, fan_in):
        bound = 1.0 / float(fan_in) ** 0.5
        return jax.random.uniform(k, shape, jnp.float32, -bound, bound)

    w1 = uinit(ks[0], (cout, cin, KH, KW), cin * KH * KW)
    b1c = uinit(ks[1], (cout,), cin * KH * KW)
    w2 = uinit(ks[2], (cout, cout, KH, KW), cout * KH * KW)
    b2c = uinit(ks[3], (cout,), cout * KH * KW)
    g1 = 1.0 + 0.1 * jax.random.normal(ks[4], (cout,), jnp.float32)
    be1 = 0.1 * jax.random.normal(ks[5], (cout,), jnp.float32)
    g2 = 1.0 + 0.1 * jax.random.normal(ks[6], (cout,), jnp.float32)
    be2 = 0.1 * jax.random.normal(ks[7], (cout,), jnp.float32)
    m1 = jnp.zeros((cout,), jnp.float32)
    v1 = jnp.ones((cout,), jnp.float32)
    m2 = jnp.zeros((cout,), jnp.float32)
    v2 = jnp.ones((cout,), jnp.float32)
    raw = (w1, b1c, g1, be1, m1, v1, w2, b2c, g2, be2, m2, v2)

    def fold(w, bc, g, be, m, v):
        scale = g / jnp.sqrt(v + EPS)
        bias = (bc - m) * scale + be
        # OIHW -> [tap = dy*3 + dx, Cin, Cout]; bf16 for the MXU.
        wk = jnp.transpose(w, (2, 3, 1, 0)).reshape(KH * KW, w.shape[1], w.shape[0])
        return wk.astype(jnp.bfloat16), scale.reshape(1, -1), bias.reshape(1, -1)

    w1k, s1, b1 = fold(w1, b1c, g1, be1, m1, v1)
    w2k, s2, b2 = fold(w2, b2c, g2, be2, m2, v2)
    return raw, (w1k, s1, b1, w2k, s2, b2)


def reference_forward(x_nchw, raw):
    """Exact f32 reference of Down_Block (maxpool -> VGG block, eval-mode BN)."""
    (w1, b1c, g1, be1, m1, v1, w2, b2c, g2, be2, m2, v2) = raw
    pooled = lax.reduce_window(x_nchw, -jnp.inf, lax.max,
                               (1, 1, POOL, POOL), (1, 1, POOL, POOL), 'VALID')

    def conv_bn_relu(x, w, bc, g, be, m, v):
        y = lax.conv_general_dilated(x, w, (1, 1), 'SAME',
                                     dimension_numbers=('NCHW', 'OIHW', 'NCHW'),
                                     precision=lax.Precision.HIGHEST)
        y = y + bc[None, :, None, None]
        y = (y - m[None, :, None, None]) / jnp.sqrt(v[None, :, None, None] + EPS)
        y = y * g[None, :, None, None] + be[None, :, None, None]
        return jnp.maximum(y, 0.0)

    h = conv_bn_relu(pooled, w1, b1c, g1, be1, m1, v1)
    return conv_bn_relu(h, w2, b2c, g2, be2, m2, v2)


def bf16_matched_reference(x_nchw, fused_params):
    """Pure-JAX model of the kernel's numerics (bf16 operands, f32 accumulate)."""
    w1k, s1, b1, w2k, s2, b2 = fused_params

    def f32(a):
        return a.astype(jnp.float32)

    def conv_affine_relu(z, wk, s, b):
        _, ci, co = wk.shape
        w_oihw = f32(wk).reshape(KH, KW, ci, co).transpose(3, 2, 0, 1)
        y = lax.conv_general_dilated(z, w_oihw, (1, 1), 'SAME',
                                     dimension_numbers=('NCHW', 'OIHW', 'NCHW'),
                                     precision=lax.Precision.HIGHEST)
        return jnp.maximum(y * s.reshape(1, -1, 1, 1) + b.reshape(1, -1, 1, 1), 0.0)

    xq = f32(x_nchw.astype(jnp.bfloat16))          # wrapper casts x to bf16
    pooled = lax.reduce_window(xq, -jnp.inf, lax.max,
                               (1, 1, POOL, POOL), (1, 1, POOL, POOL), 'VALID')
    h1 = conv_affine_relu(pooled, w1k, s1, b1)
    h1 = f32(h1.astype(jnp.bfloat16))              # conv2 operands are bf16 in-kernel
    return conv_affine_relu(h1, w2k, s2, b2)


if __name__ == "__main__":
    key = jax.random.PRNGKey(0)
    kx, kp = jax.random.split(key)

    N, Cin, H, W = 2, 4, 16, 16
    Cout = 8
    x = jax.random.normal(kx, (N, Cin, H, W), jnp.float32)
    raw, fused = init_params(kp, Cin, Cout)

    out = jax.block_until_ready(down_block_forward(x, fused))
    assert out.shape == (N, Cout, H // POOL, W // POOL), out.shape

    # Tight check against a pure-JAX model of the kernel's own numerics
    # (bf16 matmul operands, f32 accumulation): validates kernel structure.
    qref = bf16_matched_reference(x, fused)
    tight_err = float(jnp.max(jnp.abs(out - qref)))
    assert tight_err < 2e-3, f"mismatch vs bf16-matched reference: {tight_err}"

    # Loose check against the exact f32 reference: the remaining gap is bf16
    # operand rounding only (tolerance relaxed as flagged in the review).
    ref = reference_forward(x, raw)
    loose_err = float(jnp.max(jnp.abs(out - ref)))
    assert loose_err < 1e-1, f"bf16 deviation from f32 reference too large: {loose_err}"

    print("KERNEL_OK")
</pallas_src>

<mosaic_0001>
module attributes {stable_mosaic.version = 11 : i64} {
  func.func @_down_block_kernel(%arg0: i32, %arg1: memref<1x8x2x8x8xbf16, #tpu.memory_space<vmem>>, %arg2: memref<9x4x8xbf16, #tpu.memory_space<vmem>>, %arg3: memref<1x8xf32, #tpu.memory_space<vmem>>, %arg4: memref<1x8xf32, #tpu.memory_space<vmem>>, %arg5: memref<9x8x8xbf16, #tpu.memory_space<vmem>>, %arg6: memref<1x8xf32, #tpu.memory_space<vmem>>, %arg7: memref<1x8xf32, #tpu.memory_space<vmem>>, %arg8: memref<1x8x8x8xf32, #tpu.memory_space<vmem>>, %arg9: memref<10x10x4xf32, #tpu.memory_space<vmem>>, %arg10: memref<10x10x8xf32, #tpu.memory_space<vmem>>) attributes {dimension_semantics = [#tpu.dimension_semantics<parallel>], iteration_bounds = array<i64: 2>, scalar_prefetch = 0 : i64, scratch_operands = 2 : i64, tpu.core_type = #tpu.core_type<tc>, window_params = [{transform_indices = @transform_0, window_bounds = array<i64: 1, 8, 2, 8, 8>}, {pipeline_mode = #tpu.pipeline_mode<synchronous>, transform_indices = @transform_1, window_bounds = array<i64: 9, 4, 8>}, {pipeline_mode = #tpu.pipeline_mode<synchronous>, transform_indices = @transform_2, window_bounds = array<i64: 1, 8>}, {pipeline_mode = #tpu.pipeline_mode<synchronous>, transform_indices = @transform_3, window_bounds = array<i64: 1, 8>}, {pipeline_mode = #tpu.pipeline_mode<synchronous>, transform_indices = @transform_4, window_bounds = array<i64: 9, 8, 8>}, {pipeline_mode = #tpu.pipeline_mode<synchronous>, transform_indices = @transform_5, window_bounds = array<i64: 1, 8>}, {pipeline_mode = #tpu.pipeline_mode<synchronous>, transform_indices = @transform_6, window_bounds = array<i64: 1, 8>}, {transform_indices = @transform_7, window_bounds = array<i64: 1, 8, 8, 8>}]} {
    %c0 = arith.constant 0 : index
    %c0_0 = arith.constant 0 : index
    %c0_1 = arith.constant 0 : index
    %c0_2 = arith.constant 0 : index
    %c0_3 = arith.constant 0 : index
    %0 = vector.load %arg1[%c0, %c0_0, %c0_1, %c0_2, %c0_3] : memref<1x8x2x8x8xbf16, #tpu.memory_space<vmem>>, vector<1x8x2x8x8xbf16>
    %1 = vector.shape_cast %0 : vector<1x8x2x8x8xbf16> to vector<8x2x8x8xbf16>
    %2 = vector.extract_strided_slice %1 {offsets = [0, 0, 0, 0], sizes = [8, 1, 8, 8], strides = [1, 1, 1, 1]} : vector<8x2x8x8xbf16> to vector<8x1x8x8xbf16>
    %3 = vector.shape_cast %2 : vector<8x1x8x8xbf16> to vector<8x8x8xbf16>
    %4 = vector.extract_strided_slice %1 {offsets = [0, 1, 0, 0], sizes = [8, 1, 8, 8], strides = [1, 1, 1, 1]} : vector<8x2x8x8xbf16> to vector<8x1x8x8xbf16>
    %5 = vector.shape_cast %4 : vector<8x1x8x8xbf16> to vector<8x8x8xbf16>
    %6 = arith.maximumf %3, %5 : vector<8x8x8xbf16>
    %7 = vector.extract_strided_slice %6 {offsets = [0, 0, 0], sizes = [8, 8, 4], strides = [1, 1, 1]} : vector<8x8x8xbf16> to vector<8x8x4xbf16>
    %8 = vector.extract_strided_slice %6 {offsets = [0, 0, 4], sizes = [8, 8, 4], strides = [1, 1, 1]} : vector<8x8x8xbf16> to vector<8x8x4xbf16>
    %9 = arith.maximumf %7, %8 : vector<8x8x4xbf16>
    %cst = arith.constant 0.000000e+00 : f32
    %10 = vector.broadcast %cst : f32 to vector<1x10x4xf32>
    %c0_4 = arith.constant 0 : index
    %c0_5 = arith.constant 0 : index
    %c0_6 = arith.constant 0 : index
    %11 = vector.load %arg9[%c0_4, %c0_5, %c0_6] : memref<10x10x4xf32, #tpu.memory_space<vmem>>, vector<1x10x4xf32>
    tpu.vector_store %arg9[%c0_4, %c0_5, %c0_6], %10 {strides = array<i32>} : memref<10x10x4xf32, #tpu.memory_space<vmem>>, vector<1x10x4xf32>,
    %c9 = arith.constant 9 : index
    %c0_7 = arith.constant 0 : index
    %c0_8 = arith.constant 0 : index
    %12 = vector.load %arg9[%c9, %c0_7, %c0_8] : memref<10x10x4xf32, #tpu.memory_space<vmem>>, vector<1x10x4xf32>
    tpu.vector_store %arg9[%c9, %c0_7, %c0_8], %10 {strides = array<i32>} : memref<10x10x4xf32, #tpu.memory_space<vmem>>, vector<1x10x4xf32>,
    %cst_9 = arith.constant 0.000000e+00 : f32
    %13 = vector.broadcast %cst_9 : f32 to vector<10x1x4xf32>
    %c0_10 = arith.constant 0 : index
    %c0_11 = arith.constant 0 : index
    %c0_12 = arith.constant 0 : index
    %14 = vector.load %arg9[%c0_10, %c0_11, %c0_12] : memref<10x10x4xf32, #tpu.memory_space<vmem>>, vector<10x1x4xf32>
    tpu.vector_store %arg9[%c0_10, %c0_11, %c0_12], %13 {strides = array<i32>} : memref<10x10x4xf32, #tpu.memory_space<vmem>>, vector<10x1x4xf32>,
    %c0_13 = arith.constant 0 : index
    %c9_14 = arith.constant 9 : index
    %c0_15 = arith.constant 0 : index
    %15 = vector.load %arg9[%c0_13, %c9_14, %c0_15] : memref<10x10x4xf32, #tpu.memory_space<vmem>>, vector<10x1x4xf32>
    tpu.vector_store %arg9[%c0_13, %c9_14, %c0_15], %13 {strides = array<i32>} : memref<10x10x4xf32, #tpu.memory_space<vmem>>, vector<10x1x4xf32>,
    %16 = arith.extf %9 : vector<8x8x4xbf16> to vector<8x8x4xf32>
    %c1 = arith.constant 1 : index
    %c1_16 = arith.constant 1 : index
    %c0_17 = arith.constant 0 : index
    %17 = vector.load %arg9[%c1, %c1_16, %c0_17] : memref<10x10x4xf32, #tpu.memory_space<vmem>>, vector<8x8x4xf32>
    tpu.vector_store %arg9[%c1, %c1_16, %c0_17], %16 {strides = array<i32>} : memref<10x10x4xf32, #tpu.memory_space<vmem>>, vector<8x8x4xf32>,
    %cst_18 = arith.constant 0.000000e+00 : f32
    %18 = vector.broadcast %cst_18 : f32 to vector<64x8xf32>
    %cst_19 = arith.constant 0.000000e+00 : f32
    %19 = vector.broadcast %cst_19 : f32 to vector<64x8xf32>
    %c0_20 = arith.constant 0 : index
    %c0_21 = arith.constant 0 : index
    %c0_22 = arith.constant 0 : index
    %20 = vector.load %arg9[%c0_20, %c0_21, %c0_22] : memref<10x10x4xf32, #tpu.memory_space<vmem>>, vector<8x8x4xf32>
    %21 = vector.shape_cast %20 : vector<8x8x4xf32> to vector<64x4xf32>
    %22 = arith.truncf %21 : vector<64x4xf32> to vector<64x4xbf16>
    %c0_23 = arith.constant 0 : index
    %c0_24 = arith.constant 0 : index
    %c0_25 = arith.constant 0 : index
    %23 = vector.load %arg2[%c0_23, %c0_24, %c0_25] : memref<9x4x8xbf16, #tpu.memory_space<vmem>>, vector<1x4x8xbf16>
    %24 = vector.shape_cast %23 : vector<1x4x8xbf16> to vector<4x8xbf16>
    %cst_26 = arith.constant dense<0.000000e+00> : vector<64x8xf32>
    %25 = tpu.matmul %22, %24, %cst_26 {dimension_numbers = #tpu.dot_dimension_numbers<[1], [0], [0], [1], [0, 0, 1, 1], [], []>} : vector<64x4xbf16>, vector<4x8xbf16>, vector<64x8xf32> -> vector<64x8xf32>
    %26 = arith.addf %18, %25 : vector<64x8xf32>
    %c0_27 = arith.constant 0 : index
    %c1_28 = arith.constant 1 : index
    %c0_29 = arith.constant 0 : index
    %27 = vector.load %arg9[%c0_27, %c1_28, %c0_29] : memref<10x10x4xf32, #tpu.memory_space<vmem>>, vector<8x8x4xf32>
    %28 = vector.shape_cast %27 : vector<8x8x4xf32> to vector<64x4xf32>
    %29 = arith.truncf %28 : vector<64x4xf32> to vector<64x4xbf16>
    %c1_30 = arith.constant 1 : index
    %c0_31 = arith.constant 0 : index
    %c0_32 = arith.constant 0 : index
    %30 = vector.load %arg2[%c1_30, %c0_31, %c0_32] : memref<9x4x8xbf16, #tpu.memory_space<vmem>>, vector<1x4x8xbf16>
    %31 = vector.shape_cast %30 : vector<1x4x8xbf16> to vector<4x8xbf16>
    %cst_33 = arith.constant dense<0.000000e+00> : vector<64x8xf32>
    %32 = tpu.matmul %29, %31, %cst_33 {dimension_numbers = #tpu.dot_dimension_numbers<[1], [0], [0], [1], [0, 0, 1, 1], [], []>} : vector<64x4xbf16>, vector<4x8xbf16>, vector<64x8xf32> -> vector<64x8xf32>
    %33 = arith.addf %19, %32 : vector<64x8xf32>
    %c0_34 = arith.constant 0 : index
    %c2 = arith.constant 2 : index
    %c0_35 = arith.constant 0 : index
    %34 = vector.load %arg9[%c0_34, %c2, %c0_35] : memref<10x10x4xf32, #tpu.memory_space<vmem>>, vector<8x8x4xf32>
    %35 = vector.shape_cast %34 : vector<8x8x4xf32> to vector<64x4xf32>
    %36 = arith.truncf %35 : vector<64x4xf32> to vector<64x4xbf16>
    %c2_36 = arith.constant 2 : index
    %c0_37 = arith.constant 0 : index
    %c0_38 = arith.constant 0 : index
    %37 = vector.load %arg2[%c2_36, %c0_37, %c0_38] : memref<9x4x8xbf16, #tpu.memory_space<vmem>>, vector<1x4x8xbf16>
    %38 = vector.shape_cast %37 : vector<1x4x8xbf16> to vector<4x8xbf16>
    %cst_39 = arith.constant dense<0.000000e+00> : vector<64x8xf32>
    %39 = tpu.matmul %36, %38, %cst_39 {dimension_numbers = #tpu.dot_dimension_numbers<[1], [0], [0], [1], [0, 0, 1, 1], [], []>} : vector<64x4xbf16>, vector<4x8xbf16>, vector<64x8xf32> -> vector<64x8xf32>
    %40 = arith.addf %26, %39 : vector<64x8xf32>
    %c1_40 = arith.constant 1 : index
    %c0_41 = arith.constant 0 : index
    %c0_42 = arith.constant 0 : index
    %41 = vector.load %arg9[%c1_40, %c0_41, %c0_42] : memref<10x10x4xf32, #tpu.memory_space<vmem>>, vector<8x8x4xf32>
    %42 = vector.shape_cast %41 : vector<8x8x4xf32> to vector<64x4xf32>
    %43 = arith.truncf %42 : vector<64x4xf32> to vector<64x4xbf16>
    %c3 = arith.constant 3 : index
    %c0_43 = arith.constant 0 : index
    %c0_44 = arith.constant 0 : index
    %44 = vector.load %arg2[%c3, %c0_43, %c0_44] : memref<9x4x8xbf16, #tpu.memory_space<vmem>>, vector<1x4x8xbf16>
    %45 = vector.shape_cast %44 : vector<1x4x8xbf16> to vector<4x8xbf16>
    %cst_45 = arith.constant dense<0.000000e+00> : vector<64x8xf32>
    %46 = tpu.matmul %43, %45, %cst_45 {dimension_numbers = #tpu.dot_dimension_numbers<[1], [0], [0], [1], [0, 0, 1, 1], [], []>} : vector<64x4xbf16>, vector<4x8xbf16>, vector<64x8xf32> -> vector<64x8xf32>
    %47 = arith.addf %33, %46 : vector<64x8xf32>
    %c1_46 = arith.constant 1 : index
    %c1_47 = arith.constant 1 : index
    %c0_48 = arith.constant 0 : index
    %48 = vector.load %arg9[%c1_46, %c1_47, %c0_48] : memref<10x10x4xf32, #tpu.memory_space<vmem>>, vector<8x8x4xf32>
    %49 = vector.shape_cast %48 : vector<8x8x4xf32> to vector<64x4xf32>
    %50 = arith.truncf %49 : vector<64x4xf32> to vector<64x4xbf16>
    %c4 = arith.constant 4 : index
    %c0_49 = arith.constant 0 : index
    %c0_50 = arith.constant 0 : index
    %51 = vector.load %arg2[%c4, %c0_49, %c0_50] : memref<9x4x8xbf16, #tpu.memory_space<vmem>>, vector<1x4x8xbf16>
    %52 = vector.shape_cast %51 : vector<1x4x8xbf16> to vector<4x8xbf16>
    %cst_51 = arith.constant dense<0.000000e+00> : vector<64x8xf32>
    %53 = tpu.matmul %50, %52, %cst_51 {dimension_numbers = #tpu.dot_dimension_numbers<[1], [0], [0], [1], [0, 0, 1, 1], [], []>} : vector<64x4xbf16>, vector<4x8xbf16>, vector<64x8xf32> -> vector<64x8xf32>
    %54 = arith.addf %40, %53 : vector<64x8xf32>
    %c1_52 = arith.constant 1 : index
    %c2_53 = arith.constant 2 : index
    %c0_54 = arith.constant 0 : index
    %55 = vector.load %arg9[%c1_52, %c2_53, %c0_54] : memref<10x10x4xf32, #tpu.memory_space<vmem>>, vector<8x8x4xf32>
    %56 = vector.shape_cast %55 : vector<8x8x4xf32> to vector<64x4xf32>
    %57 = arith.truncf %56 : vector<64x4xf32> to vector<64x4xbf16>
    %c5 = arith.constant 5 : index
    %c0_55 = arith.constant 0 : index
    %c0_56 = arith.constant 0 : index
    %58 = vector.load %arg2[%c5, %c0_55, %c0_56] : memref<9x4x8xbf16, #tpu.memory_space<vmem>>, vector<1x4x8xbf16>
    %59 = vector.shape_cast %58 : vector<1x4x8xbf16> to vector<4x8xbf16>
    %cst_57 = arith.constant dense<0.000000e+00> : vector<64x8xf32>
    %60 = tpu.matmul %57, %59, %cst_57 {dimension_numbers = #tpu.dot_dimension_numbers<[1], [0], [0], [1], [0, 0, 1, 1], [], []>} : vector<64x4xbf16>, vector<4x8xbf16>, vector<64x8xf32> -> vector<64x8xf32>
    %61 = arith.addf %47, %60 : vector<64x8xf32>
    %c2_58 = arith.constant 2 : index
    %c0_59 = arith.constant 0 : index
    %c0_60 = arith.constant 0 : index
    %62 = vector.load %arg9[%c2_58, %c0_59, %c0_60] : memref<10x10x4xf32, #tpu.memory_space<vmem>>, vector<8x8x4xf32>
    %63 = vector.shape_cast %62 : vector<8x8x4xf32> to vector<64x4xf32>
    %64 = arith.truncf %63 : vector<64x4xf32> to vector<64x4xbf16>
    %c6 = arith.constant 6 : index
    %c0_61 = arith.constant 0 : index
    %c0_62 = arith.constant 0 : index
    %65 = vector.load %arg2[%c6, %c0_61, %c0_62] : memref<9x4x8xbf16, #tpu.memory_space<vmem>>, vector<1x4x8xbf16>
    %66 = vector.shape_cast %65 : vector<1x4x8xbf16> to vector<4x8xbf16>
    %cst_63 = arith.constant dense<0.000000e+00> : vector<64x8xf32>
    %67 = tpu.matmul %64, %66, %cst_63 {dimension_numbers = #tpu.dot_dimension_numbers<[1], [0], [0], [1], [0, 0, 1, 1], [], []>} : vector<64x4xbf16>, vector<4x8xbf16>, vector<64x8xf32> -> vector<64x8xf32>
    %68 = arith.addf %54, %67 : vector<64x8xf32>
    %c2_64 = arith.constant 2 : index
    %c1_65 = arith.constant 1 : index
    %c0_66 = arith.constant 0 : index
    %69 = vector.load %arg9[%c2_64, %c1_65, %c0_66] : memref<10x10x4xf32, #tpu.memory_space<vmem>>, vector<8x8x4xf32>
    %70 = vector.shape_cast %69 : vector<8x8x4xf32> to vector<64x4xf32>
    %71 = arith.truncf %70 : vector<64x4xf32> to vector<64x4xbf16>
    %c7 = arith.constant 7 : index
    %c0_67 = arith.constant 0 : index
    %c0_68 = arith.constant 0 : index
    %72 = vector.load %arg2[%c7, %c0_67, %c0_68] : memref<9x4x8xbf16, #tpu.memory_space<vmem>>, vector<1x4x8xbf16>
    %73 = vector.shape_cast %72 : vector<1x4x8xbf16> to vector<4x8xbf16>
    %cst_69 = arith.constant dense<0.000000e+00> : vector<64x8xf32>
    %74 = tpu.matmul %71, %73, %cst_69 {dimension_numbers = #tpu.dot_dimension_numbers<[1], [0], [0], [1], [0, 0, 1, 1], [], []>} : vector<64x4xbf16>, vector<4x8xbf16>, vector<64x8xf32> -> vector<64x8xf32>
    %75 = arith.addf %61, %74 : vector<64x8xf32>
    %c2_70 = arith.constant 2 : index
    %c2_71 = arith.constant 2 : index
    %c0_72 = arith.constant 0 : index
    %76 = vector.load %arg9[%c2_70, %c2_71, %c0_72] : memref<10x10x4xf32, #tpu.memory_space<vmem>>, vector<8x8x4xf32>
    %77 = vector.shape_cast %76 : vector<8x8x4xf32> to vector<64x4xf32>
    %78 = arith.truncf %77 : vector<64x4xf32> to vector<64x4xbf16>
    %c8 = arith.constant 8 : index
    %c0_73 = arith.constant 0 : index
    %c0_74 = arith.constant 0 : index
    %79 = vector.load %arg2[%c8, %c0_73, %c0_74] : memref<9x4x8xbf16, #tpu.memory_space<vmem>>, vector<1x4x8xbf16>
    %80 = vector.shape_cast %79 : vector<1x4x8xbf16> to vector<4x8xbf16>
    %cst_75 = arith.constant dense<0.000000e+00> : vector<64x8xf32>
    %81 = tpu.matmul %78, %80, %cst_75 {dimension_numbers = #tpu.dot_dimension_numbers<[1], [0], [0], [1], [0, 0, 1, 1], [], []>} : vector<64x4xbf16>, vector<4x8xbf16>, vector<64x8xf32> -> vector<64x8xf32>
    %82 = arith.addf %68, %81 : vector<64x8xf32>
    %83 = arith.addf %82, %75 : vector<64x8xf32>
    %c0_76 = arith.constant 0 : index
    %c0_77 = arith.constant 0 : index
    %84 = vector.load %arg3[%c0_76, %c0_77] : memref<1x8xf32, #tpu.memory_space<vmem>>, vector<1x8xf32>
    %85 = vector.broadcast %84 : vector<1x8xf32> to vector<64x8xf32>
    %86 = arith.mulf %83, %85 : vector<64x8xf32>
    %c0_78 = arith.constant 0 : index
    %c0_79 = arith.constant 0 : index
    %87 = vector.load %arg4[%c0_78, %c0_79] : memref<1x8xf32, #tpu.memory_space<vmem>>, vector<1x8xf32>
    %88 = vector.broadcast %87 : vector<1x8xf32> to vector<64x8xf32>
    %89 = arith.addf %86, %88 : vector<64x8xf32>
    %cst_80 = arith.constant 0.000000e+00 : f32
    %90 = vector.broadcast %cst_80 : f32 to vector<64x8xf32>
    %91 = arith.maximumf %89, %90 : vector<64x8xf32>
    %cst_81 = arith.constant 0.000000e+00 : f32
    %92 = vector.broadcast %cst_81 : f32 to vector<1x10x8xf32>
    %c0_82 = arith.constant 0 : index
    %c0_83 = arith.constant 0 : index
    %c0_84 = arith.constant 0 : index
    %93 = vector.load %arg10[%c0_82, %c0_83, %c0_84] : memref<10x10x8xf32, #tpu.memory_space<vmem>>, vector<1x10x8xf32>
    tpu.vector_store %arg10[%c0_82, %c0_83, %c0_84], %92 {strides = array<i32>} : memref<10x10x8xf32, #tpu.memory_space<vmem>>, vector<1x10x8xf32>,
    %c9_85 = arith.constant 9 : index
    %c0_86 = arith.constant 0 : index
    %c0_87 = arith.constant 0 : index
    %94 = vector.load %arg10[%c9_85, %c0_86, %c0_87] : memref<10x10x8xf32, #tpu.memory_space<vmem>>, vector<1x10x8xf32>
    tpu.vector_store %arg10[%c9_85, %c0_86, %c0_87], %92 {strides = array<i32>} : memref<10x10x8xf32, #tpu.memory_space<vmem>>, vector<1x10x8xf32>,
    %cst_88 = arith.constant 0.000000e+00 : f32
    %95 = vector.broadcast %cst_88 : f32 to vector<10x1x8xf32>
    %c0_89 = arith.constant 0 : index
    %c0_90 = arith.constant 0 : index
    %c0_91 = arith.constant 0 : index
    %96 = vector.load %arg10[%c0_89, %c0_90, %c0_91] : memref<10x10x8xf32, #tpu.memory_space<vmem>>, vector<10x1x8xf32>
    tpu.vector_store %arg10[%c0_89, %c0_90, %c0_91], %95 {strides = array<i32>} : memref<10x10x8xf32, #tpu.memory_space<vmem>>, vector<10x1x8xf32>,
    %c0_92 = arith.constant 0 : index
    %c9_93 = arith.constant 9 : index
    %c0_94 = arith.constant 0 : index
    %97 = vector.load %arg10[%c0_92, %c9_93, %c0_94] : memref<10x10x8xf32, #tpu.memory_space<vmem>>, vector<10x1x8xf32>
    tpu.vector_store %arg10[%c0_92, %c9_93, %c0_94], %95 {strides = array<i32>} : memref<10x10x8xf32, #tpu.memory_space<vmem>>, vector<10x1x8xf32>,
    %98 = vector.shape_cast %91 : vector<64x8xf32> to vector<8x8x8xf32>
    %c1_95 = arith.constant 1 : index
    %c1_96 = arith.constant 1 : index
    %c0_97 = arith.constant 0 : index
    %99 = vector.load %arg10[%c1_95, %c1_96, %c0_97] : memref<10x10x8xf32, #tpu.memory_space<vmem>>, vector<8x8x8xf32>
    tpu.vector_store %arg10[%c1_95, %c1_96, %c0_97], %98 {strides = array<i32>} : memref<10x10x8xf32, #tpu.memory_space<vmem>>, vector<8x8x8xf32>,
    %cst_98 = arith.constant 0.000000e+00 : f32
    %100 = vector.broadcast %cst_98 : f32 to vector<64x8xf32>
    %cst_99 = arith.constant 0.000000e+00 : f32
    %101 = vector.broadcast %cst_99 : f32 to vector<64x8xf32>
    %c0_100 = arith.constant 0 : index
    %c0_101 = arith.constant 0 : index
    %c0_102 = arith.constant 0 : index
    %102 = vector.load %arg10[%c0_100, %c0_101, %c0_102] : memref<10x10x8xf32, #tpu.memory_space<vmem>>, vector<8x8x8xf32>
    %103 = vector.shape_cast %102 : vector<8x8x8xf32> to vector<64x8xf32>
    %104 = arith.truncf %103 : vector<64x8xf32> to vector<64x8xbf16>
    %c0_103 = arith.constant 0 : index
    %c0_104 = arith.constant 0 : index
    %c0_105 = arith.constant 0 : index
    %105 = vector.load %arg5[%c0_103, %c0_104, %c0_105] : memref<9x8x8xbf16, #tpu.memory_space<vmem>>, vector<1x8x8xbf16>
    %106 = vector.shape_cast %105 : vector<1x8x8xbf16> to vector<8x8xbf16>
    %cst_106 = arith.constant dense<0.000000e+00> : vector<64x8xf32>
    %107 = tpu.matmul %104, %106, %cst_106 {dimension_numbers = #tpu.dot_dimension_numbers<[1], [0], [0], [1], [0, 0, 1, 1], [], []>} : vector<64x8xbf16>, vector<8x8xbf16>, vector<64x8xf32> -> vector<64x8xf32>
    %108 = arith.addf %100, %107 : vector<64x8xf32>
    %c0_107 = arith.constant 0 : index
    %c1_108 = arith.constant 1 : index
    %c0_109 = arith.constant 0 : index
    %109 = vector.load %arg10[%c0_107, %c1_108, %c0_109] : memref<10x10x8xf32, #tpu.memory_space<vmem>>, vector<8x8x8xf32>
    %110 = vector.shape_cast %109 : vector<8x8x8xf32> to vector<64x8xf32>
    %111 = arith.truncf %110 : vector<64x8xf32> to vector<64x8xbf16>
    %c1_110 = arith.constant 1 : index
    %c0_111 = arith.constant 0 : index
    %c0_112 = arith.constant 0 : index
    %112 = vector.load %arg5[%c1_110, %c0_111, %c0_112] : memref<9x8x8xbf16, #tpu.memory_space<vmem>>, vector<1x8x8xbf16>
    %113 = vector.shape_cast %112 : vector<1x8x8xbf16> to vector<8x8xbf16>
    %cst_113 = arith.constant dense<0.000000e+00> : vector<64x8xf32>
    %114 = tpu.matmul %111, %113, %cst_113 {dimension_numbers = #tpu.dot_dimension_numbers<[1], [0], [0], [1], [0, 0, 1, 1], [], []>} : vector<64x8xbf16>, vector<8x8xbf16>, vector<64x8xf32> -> vector<64x8xf32>
    %115 = arith.addf %101, %114 : vector<64x8xf32>
    %c0_114 = arith.constant 0 : index
    %c2_115 = arith.constant 2 : index
    %c0_116 = arith.constant 0 : index
    %116 = vector.load %arg10[%c0_114, %c2_115, %c0_116] : memref<10x10x8xf32, #tpu.memory_space<vmem>>, vector<8x8x8xf32>
    %117 = vector.shape_cast %116 : vector<8x8x8xf32> to vector<64x8xf32>
    %118 = arith.truncf %117 : vector<64x8xf32> to vector<64x8xbf16>
    %c2_117 = arith.constant 2 : index
    %c0_118 = arith.constant 0 : index
    %c0_119 = arith.constant 0 : index
    %119 = vector.load %arg5[%c2_117, %c0_118, %c0_119] : memref<9x8x8xbf16, #tpu.memory_space<vmem>>, vector<1x8x8xbf16>
    %120 = vector.shape_cast %119 : vector<1x8x8xbf16> to vector<8x8xbf16>
    %cst_120 = arith.constant dense<0.000000e+00> : vector<64x8xf32>
    %121 = tpu.matmul %118, %120, %cst_120 {dimension_numbers = #tpu.dot_dimension_numbers<[1], [0], [0], [1], [0, 0, 1, 1], [], []>} : vector<64x8xbf16>, vector<8x8xbf16>, vector<64x8xf32> -> vector<64x8xf32>
    %122 = arith.addf %108, %121 : vector<64x8xf32>
    %c1_121 = arith.constant 1 : index
    %c0_122 = arith.constant 0 : index
    %c0_123 = arith.constant 0 : index
    %123 = vector.load %arg10[%c1_121, %c0_122, %c0_123] : memref<10x10x8xf32, #tpu.memory_space<vmem>>, vector<8x8x8xf32>
    %124 = vector.shape_cast %123 : vector<8x8x8xf32> to vector<64x8xf32>
    %125 = arith.truncf %124 : vector<64x8xf32> to vector<64x8xbf16>
    %c3_124 = arith.constant 3 : index
    %c0_125 = arith.constant 0 : index
    %c0_126 = arith.constant 0 : index
    %126 = vector.load %arg5[%c3_124, %c0_125, %c0_126] : memref<9x8x8xbf16, #tpu.memory_space<vmem>>, vector<1x8x8xbf16>
    %127 = vector.shape_cast %126 : vector<1x8x8xbf16> to vector<8x8xbf16>
    %cst_127 = arith.constant dense<0.000000e+00> : vector<64x8xf32>
    %128 = tpu.matmul %125, %127, %cst_127 {dimension_numbers = #tpu.dot_dimension_numbers<[1], [0], [0], [1], [0, 0, 1, 1], [], []>} : vector<64x8xbf16>, vector<8x8xbf16>, vector<64x8xf32> -> vector<64x8xf32>
    %129 = arith.addf %115, %128 : vector<64x8xf32>
    %c1_128 = arith.constant 1 : index
    %c1_129 = arith.constant 1 : index
    %c0_130 = arith.constant 0 : index
    %130 = vector.load %arg10[%c1_128, %c1_129, %c0_130] : memref<10x10x8xf32, #tpu.memory_space<vmem>>, vector<8x8x8xf32>
    %131 = vector.shape_cast %130 : vector<8x8x8xf32> to vector<64x8xf32>
    %132 = arith.truncf %131 : vector<64x8xf32> to vector<64x8xbf16>
    %c4_131 = arith.constant 4 : index
    %c0_132 = arith.constant 0 : index
    %c0_133 = arith.constant 0 : index
    %133 = vector.load %arg5[%c4_131, %c0_132, %c0_133] : memref<9x8x8xbf16, #tpu.memory_space<vmem>>, vector<1x8x8xbf16>
    %134 = vector.shape_cast %133 : vector<1x8x8xbf16> to vector<8x8xbf16>
    %cst_134 = arith.constant dense<0.000000e+00> : vector<64x8xf32>
    %135 = tpu.matmul %132, %134, %cst_134 {dimension_numbers = #tpu.dot_dimension_numbers<[1], [0], [0], [1], [0, 0, 1, 1], [], []>} : vector<64x8xbf16>, vector<8x8xbf16>, vector<64x8xf32> -> vector<64x8xf32>
    %136 = arith.addf %122, %135 : vector<64x8xf32>
    %c1_135 = arith.constant 1 : index
    %c2_136 = arith.constant 2 : index
    %c0_137 = arith.constant 0 : index
    %137 = vector.load %arg10[%c1_135, %c2_136, %c0_137] : memref<10x10x8xf32, #tpu.memory_space<vmem>>, vector<8x8x8xf32>
    %138 = vector.shape_cast %137 : vector<8x8x8xf32> to vector<64x8xf32>
    %139 = arith.truncf %138 : vector<64x8xf32> to vector<64x8xbf16>
    %c5_138 = arith.constant 5 : index
    %c0_139 = arith.constant 0 : index
    %c0_140 = arith.constant 0 : index
    %140 = vector.load %arg5[%c5_138, %c0_139, %c0_140] : memref<9x8x8xbf16, #tpu.memory_space<vmem>>, vector<1x8x8xbf16>
    %141 = vector.shape_cast %140 : vector<1x8x8xbf16> to vector<8x8xbf16>
    %cst_141 = arith.constant dense<0.000000e+00> : vector<64x8xf32>
    %142 = tpu.matmul %139, %141, %cst_141 {dimension_numbers = #tpu.dot_dimension_numbers<[1], [0], [0], [1], [0, 0, 1, 1], [], []>} : vector<64x8xbf16>, vector<8x8xbf16>, vector<64x8xf32> -> vector<64x8xf32>
    %143 = arith.addf %129, %142 : vector<64x8xf32>
    %c2_142 = arith.constant 2 : index
    %c0_143 = arith.constant 0 : index
    %c0_144 = arith.constant 0 : index
    %144 = vector.load %arg10[%c2_142, %c0_143, %c0_144] : memref<10x10x8xf32, #tpu.memory_space<vmem>>, vector<8x8x8xf32>
    %145 = vector.shape_cast %144 : vector<8x8x8xf32> to vector<64x8xf32>
    %146 = arith.truncf %145 : vector<64x8xf32> to vector<64x8xbf16>
    %c6_145 = arith.constant 6 : index
    %c0_146 = arith.constant 0 : index
    %c0_147 = arith.constant 0 : index
    %147 = vector.load %arg5[%c6_145, %c0_146, %c0_147] : memref<9x8x8xbf16, #tpu.memory_space<vmem>>, vector<1x8x8xbf16>
    %148 = vector.shape_cast %147 : vector<1x8x8xbf16> to vector<8x8xbf16>
    %cst_148 = arith.constant dense<0.000000e+00> : vector<64x8xf32>
    %149 = tpu.matmul %146, %148, %cst_148 {dimension_numbers = #tpu.dot_dimension_numbers<[1], [0], [0], [1], [0, 0, 1, 1], [], []>} : vector<64x8xbf16>, vector<8x8xbf16>, vector<64x8xf32> -> vector<64x8xf32>
    %150 = arith.addf %136, %149 : vector<64x8xf32>
    %c2_149 = arith.constant 2 : index
    %c1_150 = arith.constant 1 : index
    %c0_151 = arith.constant 0 : index
    %151 = vector.load %arg10[%c2_149, %c1_150, %c0_151] : memref<10x10x8xf32, #tpu.memory_space<vmem>>, vector<8x8x8xf32>
    %152 = vector.shape_cast %151 : vector<8x8x8xf32> to vector<64x8xf32>
    %153 = arith.truncf %152 : vector<64x8xf32> to vector<64x8xbf16>
    %c7_152 = arith.constant 7 : index
    %c0_153 = arith.constant 0 : index
    %c0_154 = arith.constant 0 : index
    %154 = vector.load %arg5[%c7_152, %c0_153, %c0_154] : memref<9x8x8xbf16, #tpu.memory_space<vmem>>, vector<1x8x8xbf16>
    %155 = vector.shape_cast %154 : vector<1x8x8xbf16> to vector<8x8xbf16>
    %cst_155 = arith.constant dense<0.000000e+00> : vector<64x8xf32>
    %156 = tpu.matmul %153, %155, %cst_155 {dimension_numbers = #tpu.dot_dimension_numbers<[1], [0], [0], [1], [0, 0, 1, 1], [], []>} : vector<64x8xbf16>, vector<8x8xbf16>, vector<64x8xf32> -> vector<64x8xf32>
    %157 = arith.addf %143, %156 : vector<64x8xf32>
    %c2_156 = arith.constant 2 : index
    %c2_157 = arith.constant 2 : index
    %c0_158 = arith.constant 0 : index
    %158 = vector.load %arg10[%c2_156, %c2_157, %c0_158] : memref<10x10x8xf32, #tpu.memory_space<vmem>>, vector<8x8x8xf32>
    %159 = vector.shape_cast %158 : vector<8x8x8xf32> to vector<64x8xf32>
    %160 = arith.truncf %159 : vector<64x8xf32> to vector<64x8xbf16>
    %c8_159 = arith.constant 8 : index
    %c0_160 = arith.constant 0 : index
    %c0_161 = arith.constant 0 : index
    %161 = vector.load %arg5[%c8_159, %c0_160, %c0_161] : memref<9x8x8xbf16, #tpu.memory_space<vmem>>, vector<1x8x8xbf16>
    %162 = vector.shape_cast %161 : vector<1x8x8xbf16> to vector<8x8xbf16>
    %cst_162 = arith.constant dense<0.000000e+00> : vector<64x8xf32>
    %163 = tpu.matmul %160, %162, %cst_162 {dimension_numbers = #tpu.dot_dimension_numbers<[1], [0], [0], [1], [0, 0, 1, 1], [], []>} : vector<64x8xbf16>, vector<8x8xbf16>, vector<64x8xf32> -> vector<64x8xf32>
    %164 = arith.addf %150, %163 : vector<64x8xf32>
    %165 = arith.addf %164, %157 : vector<64x8xf32>
    %c0_163 = arith.constant 0 : index
    %c0_164 = arith.constant 0 : index
    %166 = vector.load %arg6[%c0_163, %c0_164] : memref<1x8xf32, #tpu.memory_space<vmem>>, vector<1x8xf32>
    %167 = vector.broadcast %166 : vector<1x8xf32> to vector<64x8xf32>
    %168 = arith.mulf %165, %167 : vector<64x8xf32>
    %c0_165 = arith.constant 0 : index
    %c0_166 = arith.constant 0 : index
    %169 = vector.load %arg7[%c0_165, %c0_166] : memref<1x8xf32, #tpu.memory_space<vmem>>, vector<1x8xf32>
    %170 = vector.broadcast %169 : vector<1x8xf32> to vector<64x8xf32>
    %171 = arith.addf %168, %170 : vector<64x8xf32>
    %cst_167 = arith.constant 0.000000e+00 : f32
    %172 = vector.broadcast %cst_167 : f32 to vector<64x8xf32>
    %173 = arith.maximumf %171, %172 : vector<64x8xf32>
    %174 = vector.shape_cast %173 : vector<64x8xf32> to vector<8x8x8xf32>
    %c0_168 = arith.constant 0 : index
    %c0_169 = arith.constant 0 : index
    %c0_170 = arith.constant 0 : index
    %c0_171 = arith.constant 0 : index
    %175 = vector.load %arg8[%c0_168, %c0_169, %c0_170, %c0_171] : memref<1x8x8x8xf32, #tpu.memory_space<vmem>>, vector<1x8x8x8xf32>
    %176 = vector.shape_cast %175 : vector<1x8x8x8xf32> to vector<8x8x8xf32>
    %177 = vector.shape_cast %174 : vector<8x8x8xf32> to vector<1x8x8x8xf32>
    tpu.vector_store %arg8[%c0_168, %c0_169, %c0_170, %c0_171], %177 {strides = array<i32>} : memref<1x8x8x8xf32, #tpu.memory_space<vmem>>, vector<1x8x8x8xf32>,
    return
  }
  func.func @transform_0(%arg0: i32) -> (i32, i32, i32, i32, i32) {
    %c0_i32 = arith.constant 0 : i32
    %c0_i32_0 = arith.constant 0 : i32
    %c0_i32_1 = arith.constant 0 : i32
    %c0_i32_2 = arith.constant 0 : i32
    %c0_i32_3 = arith.constant 0 : i32
    return %arg0, %c0_i32, %c0_i32_0, %c0_i32_1, %c0_i32_2 : i32, i32, i32, i32, i32
  }
  func.func @transform_1(%arg0: i32) -> (i32, i32, i32) {
    %c0_i32 = arith.constant 0 : i32
    %c0_i32_0 = arith.constant 0 : i32
    %c0_i32_1 = arith.constant 0 : i32
    %c0_i32_2 = arith.constant 0 : i32
    return %c0_i32, %c0_i32_0, %c0_i32_1 : i32, i32, i32
  }
  func.func @transform_2(%arg0: i32) -> (i32, i32) {
    %c0_i32 = arith.constant 0 : i32
    %c0_i32_0 = arith.constant 0 : i32
    %c0_i32_1 = arith.constant 0 : i32
    return %c0_i32, %c0_i32_0 : i32, i32
  }
  func.func @transform_3(%arg0: i32) -> (i32, i32) {
    %c0_i32 = arith.constant 0 : i32
    %c0_i32_0 = arith.constant 0 : i32
    %c0_i32_1 = arith.constant 0 : i32
    return %c0_i32, %c0_i32_0 : i32, i32
  }
  func.func @transform_4(%arg0: i32) -> (i32, i32, i32) {
    %c0_i32 = arith.constant 0 : i32
    %c0_i32_0 = arith.constant 0 : i32
    %c0_i32_1 = arith.constant 0 : i32
    %c0_i32_2 = arith.constant 0 : i32
    return %c0_i32, %c0_i32_0, %c0_i32_1 : i32, i32, i32
  }
  func.func @transform_5(%arg0: i32) -> (i32, i32) {
    %c0_i32 = arith.constant 0 : i32
    %c0_i32_0 = arith.constant 0 : i32
    %c0_i32_1 = arith.constant 0 : i32
    return %c0_i32, %c0_i32_0 : i32, i32
  }
  func.func @transform_6(%arg0: i32) -> (i32, i32) {
    %c0_i32 = arith.constant 0 : i32
    %c0_i32_0 = arith.constant 0 : i32
    %c0_i32_1 = arith.constant 0 : i32
    return %c0_i32, %c0_i32_0 : i32, i32
  }
  func.func @transform_7(%arg0: i32) -> (i32, i32, i32, i32) {
    %c0_i32 = arith.constant 0 : i32
    %c0_i32_0 = arith.constant 0 : i32
    %c0_i32_1 = arith.constant 0 : i32
    %c0_i32_2 = arith.constant 0 : i32
    return %arg0, %c0_i32, %c0_i32_0, %c0_i32_1 : i32, i32, i32, i32
  }
}

</mosaic_0001>

<bundles_post_ra>
// kernel: tpu_custom_call.1
= control target key start
LH: loop header
LB: loop body
LE: loop exit
PB: predicated region body
PF: predicated region fallthrough
CT: control target
= control target key end

     0   :  { %12 = vsyncpa [#allocation5], 0  ;;  %s3723_s0 = inlined_call_operand.hbm [shape: bf16[2,8,2,8,8], index: 0, kind: input, shape index: {}]   ;;  %s3724_s1 = inlined_call_operand.vmem [shape: bf16[9,4,8], index: 1, kind: input, shape index: {}]   ;;  %s3725_s2 = inlined_call_operand.vmem [shape: f32[1,8], index: 2, kind: input, shape index: {}]   ;;  %s3726_s3 = inlined_call_operand.vmem [shape: f32[1,8], index: 3, kind: input, shape index: {}]   ;;  %s3727_s4 = inlined_call_operand.vmem [shape: bf16[9,8,8], index: 4, kind: input, shape index: {}]   ;;  %s3728_s5 = inlined_call_operand.vmem [shape: f32[1,8], index: 5, kind: input, shape index: {}]   ;;  %s3729_s6 = inlined_call_operand.vmem [shape: f32[1,8], index: 6, kind: input, shape index: {}]   ;;  %s3730_s7 = inlined_call_operand.hbm [shape: f32[2,8,8,8], index: 7, kind: output, shape index: {}]  }
   0x1   :  { %14 = vsyncpa [#allocation5 + $0x1], 0 }
   0x2   :  { %15 = vsyncpa [#allocation6], 0 }
   0x3   :  { %17 = vsyncpa [#allocation6 + $0x1], 0  ;;  %s3127_s24 = smov 0   ;;  %s3129_s25 = smov 0  }
   0x4   :  { %s3131_s26 = smov 0   ;;  %s3133_s27 = smov 0  }
   0x5 LB: > { %s3148_s28 = sadd.s32 4294967295, %s3077_s27   ;;  %s2405_s29 = sadd.s32 4294967294, %s3077_s27   ;;  %s3077_s27 = sphi %s3133_s27, %s3743_s27   ;;  %s3073_s26 = sphi %s3131_s26, %s3742_s26   ;;  %s3069_s25 = sphi %s3129_s25, %s3741_s25   ;;  %s3065_s24 = sphi %s3127_s24, %s3740_s24  }
   0x6   : > { %s3152_s30 = sadd.s32 1, %s3077_s27   ;;  %s30_s8 = sadd.s32 1, %s3073_s26 }
   0x7   : > { %s27_s9 = ssub.s32 %s3077_s27, %s3152_s30  ;;  %p37_p0 = scmp.ne.s32.totalorder %s3073_s26, %s3069_s25 }
   0x8   : > { %p28_p1 = scmp.eq.s32.totalorder %s27_s9, 0  ;;  %p38_p2 = scmp.eq.s32.totalorder %s3077_s27, 0 }
   0x9   : > { %p43_p3 = scmp.ne.s32.totalorder %s3069_s25, %s3065_s24  ;;  %p44_p4 = scmp.eq.s32.totalorder %s3148_s28, 0 }
   0xa   : > { %s3164_s10 = scalar_select %p28_p1, %s3073_s26, %s30_s8  }
   0xb   : > { %p3166_p5 = por %p38_p2, %p37_p0  ;;  %p3170_p6 = por %p44_p4, %p43_p3 }
   0xc   : > { %p193_p7 = scmp.eq.s32.totalorder %s3148_s28, 1  ;;  %p199_p8 = scmp.eq.s32.totalorder %s2405_s29, 1 }
   0xd   : > { %p2941_p10 = scmp.lt.s32.totalorder %s3077_s27, 2  ;;  %s237_s15 = sand.u32 1, %s3073_s26  }
   0xe   : > { %p3177_p11 = por %p193_p7, %p37_p0  ;;  %p3181_p12 = por %p199_p8, %p43_p3 }
   0xf   : > { %s2511_s16 = sshll.u32 %s3077_s27, 10  ;;  %s2408_s17 = sshll.u32 %s237_s15, 6 }
  0x10   : > { %s3734_s13 = scalar_select %p3177_p11, 1, 0 }
  0x11   : > { %s3735_s14 = scalar_select %p3181_p12, 1, 0 }
  0x12   : > { %s3190_s20 = scalar_lea.hbm %s3723_s0, %s2511_s16  ;;  %s241_s21 = scalar_lea.vmem [#allocation4], %s2408_s17 }
  0x13   : > { %s248_s22 = sshll.u32 %s241_s21, 4  ;;  %p3194_p13 = pnand %p2941_p10, %p3166_p5  ;;  %s3198_s22 = int_to_ptr.vmem [resolvable:$true] %s248_s22 }
  0x14   : > { %s3200_s29 = scalar_lea.sflag [#allocation5], %s237_s15  ;;  %s2981_s8 = scalar_lea.hbm %s3190_s20, 1024 }
  0x15   : > { %p2982_p0 = scmp.ne.s32.totalorder %s3190_s20, %s2981_s8  ;;  %p2983_p1 = pneg %p3194_p13 }
  0x16   : > { %s2986_s16 = scalar_lea.hbm %s3723_s0, 2048  ;;  %p2987_p4 = scmp.lt.u32.totalorder %s3190_s20, %s3723_s0 }
  0x17   : > { %p2984_p2 = pnand %p2983_p1, %p2982_p0  ;;  %p2988_p5 = scmp.lt.u32.totalorder %s2986_s16, %s2981_s8 }
  0x18   : > { %p2990_p8 = scmp.lt.u32.totalorder %s2981_s8, %s3190_s20 }
  0x19   : > { %p2985_p3 = pneg %p2984_p2  ;;  %p2989_p7 = por %p2988_p5, %p2987_p4 }
  0x1b   : > { %p2991_p10 = por %p2990_p8, %p2989_p7 }
  0x1d   : > { %p2992_p9 = pnand %p2991_p10, %p2985_p3 }
  0x1f   : > { %2995 = shalt.err (!%p2992_p9)
}
  0x20   : > { %s2996_s15 = scalar_lea.vmem %s3198_s22, 1024  ;;  %s3079_s19 = smov [#allocation4]  }
  0x21   : > { %p2997_p0 = scmp.ne.s32.totalorder %s3198_s22, %s2996_s15  ;;  %s3001_s21 = sshll.u32 %s3079_s19, 4  ;;  %s3002_s21 = int_to_ptr.vmem [resolvable:$false] %s3001_s21 }
  0x22   : > { %s3003_s9 = scalar_lea.vmem %s3002_s21, 2048  ;;  %p3004_p11 = scmp.lt.s32.totalorder %s3198_s22, %s3002_s21 }
  0x23   : > { %p2999_p2 = pnand %p2997_p0, %p2983_p1  ;;  %p3005_p4 = scmp.lt.s32.totalorder %s3003_s9, %s2996_s15 }
  0x25   : > { %p3000_p12 = pneg %p2999_p2  ;;  %p3006_p5 = por %p3005_p4, %p3004_p11 }
  0x27   : > { %p3007_p7 = pnand %p3006_p5, %p3000_p12 }
  0x29   : > { %3010 = shalt.err (!%p3007_p7)
}
  0x2a   : > { %s3080_s8 = smov 64   ;;  %s3081_s11 = smov 4  }
  0x2b   : > { %2936 = dma.hbm_to_vmem [thread:$0]  (!%p3194_p13), %s3190_s20, 1024, %s3198_s22, %s3200_s29, %s3080_s8, %s3080_s8, %s3081_s11  }
  0x2c   : > { %p2411_p9 = scmp.ge.s32.totalorder %s3077_s27, 1  ;;  %p256_p1 = scmp.lt.s32.totalorder %s3077_s27, 3 }
  0x2e   : > { %p257_p3 = pnand %p2411_p9, %p256_p1 }
  0x2f   : > { %s3231_s16 = sand.u32 (!%p257_p3), 1, %s3069_s25  }
  0x30   : > { %260 = sbr.rel (%p257_p3) target bundleno = 926 (0x39e), region = 48  ;;  %s2412_s17 = sshll.u32 (!%p257_p3), %s3231_s16, 6 }
  0x31   : > { %s263_s18 = scalar_lea.sflag (!%p257_p3), [#allocation5], %s3231_s16  ;;  %s3237_s15 = scalar_lea.vmem (!%p257_p3), [#allocation4], %s2412_s17 }
  0x37   : > { %3056 = dma.done.wait (%p3170_p6), %s263_s18, 1024  }
  0x38   : > { %3058 = vsyncadd (%p3170_p6), %s263_s18, 4294966272  ;;  %vm362_vm0 = vcmask 31744   ;;  %vm364_vm1 = vcmask 25600   ;;  %v3082_v0 = vmov 0.0   ;;  %vm369_vm2 = vcmask 24576   ;;  %s3083_s12 = smov 124  }
  0x39   : > { %363 = vst.msk [vmem:[#allocation2] sm:$0xff] %vm362_vm0, %v3082_v0  ;;  %367 = vst.msk [vmem:[#allocation2 + $0x90] sm:$0xff] %vm362_vm0, %v3082_v0  ;;  %v302_v1 = vld [vmem:[%s3237_s15 + $0x10] sm:$0xf]  ;;  %v303_v2 = vld [vmem:[%s3237_s15 + $0x14] sm:$0xf] }
  0x3a   : > { %365 = vst.msk [vmem:[#allocation2 + $0x8] sm:$0x3] %vm364_vm1, %v3082_v0  ;;  %368 = vst.msk [vmem:[#allocation2 + $0x98] sm:$0x3] %vm364_vm1, %v3082_v0  ;;  %v298_v3 = vld [vmem:[%s3237_s15] sm:$0xf]  ;;  %v316_v4 = vmax.bf16 %v303_v2, %v302_v1 }
  0x3b   : > { %370 = vst.msk [vmem:[#allocation2] sm:$0x1] %vm369_vm2, %v3082_v0  ;;  %380 = vst.msk [vmem:[#allocation2 + $0x9] sm:$0x1] %vm369_vm2, %v3082_v0  ;;  %v299_v5 = vld [vmem:[%s3237_s15 + $0x4] sm:$0xf] }
  0x3c   : > { %381 = vst.msk [vmem:[#allocation2 + $0x19] sm:$0x1] %vm369_vm2, %v3082_v0  ;;  %371 = vst.msk [vmem:[#allocation2 + $0x10] sm:$0x1] %vm369_vm2, %v3082_v0  ;;  %v304_v6 = vld [vmem:[%s3237_s15 + $0x18] sm:$0xf]  ;;  %v314_v8 = vmax.bf16 %v299_v5, %v298_v3  ;;  %334 = vrot.lane.b32.xlu1 %v316_v4, %s3083_s12 }
  0x3d   : > { %372 = vst.msk [vmem:[#allocation2 + $0x20] sm:$0x1] %vm369_vm2, %v3082_v0  ;;  %373 = vst.msk [vmem:[#allocation2 + $0x30] sm:$0x1] %vm369_vm2, %v3082_v0  ;;  %v305_v7 = vld [vmem:[%s3237_s15 + $0x1c] sm:$0xf] }
  0x3e   : > { %374 = vst.msk [vmem:[#allocation2 + $0x40] sm:$0x1] %vm369_vm2, %v3082_v0  ;;  %375 = vst.msk [vmem:[#allocation2 + $0x50] sm:$0x1] %vm369_vm2, %v3082_v0  ;;  %v300_v9 = vld [vmem:[%s3237_s15 + $0x8] sm:$0xf]  ;;  %v317_v11 = vmax.bf16 %v305_v7, %v304_v6  ;;  %330 = vrot.lane.b32.xlu0 %v314_v8, %s3083_s12 }
  0x3f   : > { %376 = vst.msk [vmem:[#allocation2 + $0x60] sm:$0x1] %vm369_vm2, %v3082_v0  ;;  %377 = vst.msk [vmem:[#allocation2 + $0x70] sm:$0x1] %vm369_vm2, %v3082_v0  ;;  %v301_v10 = vld [vmem:[%s3237_s15 + $0xc] sm:$0xf] }
  0x40   : > { %378 = vst.msk [vmem:[#allocation2 + $0x80] sm:$0x1] %vm369_vm2, %v3082_v0  ;;  %382 = vst.msk [vmem:[#allocation2 + $0x29] sm:$0x1] %vm369_vm2, %v3082_v0  ;;  %v315_v12 = vmax.bf16 %v301_v10, %v300_v9  ;;  %v308_v13 = vld [vmem:[%s3237_s15 + $0x28] sm:$0xf]  ;;  %336 = vrot.lane.b32.xlu1 %v317_v11, %s3083_s12 }
  0x41   : > { %383 = vst.msk [vmem:[#allocation2 + $0x39] sm:$0x1] %vm369_vm2, %v3082_v0  ;;  %384 = vst.msk [vmem:[#allocation2 + $0x49] sm:$0x1] %vm369_vm2, %v3082_v0  ;;  %v309_v14 = vld [vmem:[%s3237_s15 + $0x2c] sm:$0xf] }
  0x42   : > { %385 = vst.msk [vmem:[#allocation2 + $0x59] sm:$0x1] %vm369_vm2, %v3082_v0  ;;  %386 = vst.msk [vmem:[#allocation2 + $0x69] sm:$0x1] %vm369_vm2, %v3082_v0  ;;  %v306_v15 = vld [vmem:[%s3237_s15 + $0x20] sm:$0xf]  ;;  %v319_v19 = vmax.bf16 %v309_v14, %v308_v13  ;;  %332 = vrot.lane.b32.xlu0 %v315_v12, %s3083_s12 }
  0x43   : > { %387 = vst.msk [vmem:[#allocation2 + $0x79] sm:$0x1] %vm369_vm2, %v3082_v0  ;;  %388 = vst.msk [vmem:[#allocation2 + $0x89] sm:$0x1] %vm369_vm2, %v3082_v0  ;;  %v307_v16 = vld [vmem:[%s3237_s15 + $0x24] sm:$0xf] }
  0x44   : > { %389 = vst.msk [vmem:[#allocation2 + $0x99] sm:$0x1] %vm369_vm2, %v3082_v0  ;;  %379 = vst.msk [vmem:[#allocation2 + $0x90] sm:$0x1] %vm369_vm2, %v3082_v0  ;;  %v2415_v17 = vld [vmem:[%s3724_s1 + $0x4] sm:$0x3]  ;;  %v318_v21 = vmax.bf16 %v307_v16, %v306_v15  ;;  %340 = vrot.lane.b32.xlu1 %v319_v19, %s3083_s12 }
  0x45   : > { %vm460_vm3 = vcmask 1041408   ;;  %v419_v20 = vld [vmem:[%s3724_s1] sm:$0x3]  ;;  %v312_v22 = vld [vmem:[%s3237_s15 + $0x38] sm:$0xf]  ;;  %v434_v45 = vld [vmem:[#allocation2 + $0x2] sm:$0xff] }
  0x46   : > { %2911 = vmatprep.subr.msk.bf16.mxu0 %vm460_vm3, %v2415_v17  ;;  %v462_v18 = vsel %vm460_vm3, %v2415_v17, 0  ;;  %v313_v23 = vld [vmem:[%s3237_s15 + $0x3c] sm:$0xf]  ;;  %v310_v24 = vld [vmem:[%s3237_s15 + $0x30] sm:$0xf]  ;;  %338 = vrot.lane.b32.xlu0 %v318_v21, %s3083_s12  ;;  %v542_v60 = vsel %vm460_vm3, %v419_v20, 0 }
  0x47   : > { %2604 = vmatpush3.bf16.msra.mxu0 %v462_v18  ;;  %v311_v25 = vld [vmem:[%s3237_s15 + $0x34] sm:$0xf]  ;;  %v321_v26 = vmax.bf16 %v313_v23, %v312_v22  ;;  %v2424_v61 = vld [vmem:[%s3724_s1 + $0x6] sm:$0x3]  ;;  %v2414_v16 = vld [vmem:[%s3724_s1 + $0x2] sm:$0x3] }
  0x48   : > { %2912 = vmatprep.subr.msk.bf16.mxu0 %vm460_vm3, %v419_v20  ;;  %v320_v27 = vmax.bf16 %v311_v25, %v310_v24  ;;  %v636_v13 = vsel %vm460_vm3, %v2424_v61, 0  ;;  %v716_v22 = vsel %vm460_vm3, %v2414_v16, 0  ;;  %v2433_v24 = vld [vmem:[%s3724_s1 + $0x8] sm:$0x3]  ;;  %vm1340_vm4 = vcmask 64512   ;;  %s296_s11 = scalar_lea.vmem [#allocation7], %s2412_s17 }
  0x49   : > { %344 = vrot.lane.b32.xlu1 %v321_v26, %s3083_s12  ;;  %1341 = vst.msk [vmem:[#allocation3] sm:$0xff] %vm1340_vm4, %v3082_v0  ;;  %1345 = vst.msk [vmem:[#allocation3 + $0x90] sm:$0xff] %vm1340_vm4, %v3082_v0  ;;  %vm1342_vm5 = vcmask 58368   ;;  %vm1347_vm6 = vcmask 57344   ;;  %vm1430_vm7 = vcmask 1043456   ;;  %s2512_s17 = sshll.u32 %s3148_s28, 10 }
  0x4a   : > { %342 = vrot.lane.b32.xlu0 %v320_v27, %s3083_s12  ;;  %1343 = vst.msk [vmem:[#allocation3 + $0x8] sm:$0x3] %vm1342_vm5, %v3082_v0  ;;  %1346 = vst.msk [vmem:[#allocation3 + $0x98] sm:$0x3] %vm1342_vm5, %v3082_v0  ;;  %s2332_s18 = sshll.u32 %s296_s11, 4  ;;  %s3674_s20 = scalar_lea.hbm %s3730_s7, %s2512_s17  ;;  %s3676_s18 = int_to_ptr.vmem [resolvable:$true] %s2332_s18 }
  0x4b   : > { %1348 = vst.msk [vmem:[#allocation3] sm:$0x1] %vm1347_vm6, %v3082_v0  ;;  %1359 = vst.msk [vmem:[#allocation3 + $0x19] sm:$0x1] %vm1347_vm6, %v3082_v0  ;;  %s2319_s28 = scalar_lea.sflag [#allocation6], %s3231_s16  ;;  %s3011_s22 = scalar_lea.vmem %s3676_s18, 1024 }
  0x4c   : > { %1349 = vst.msk [vmem:[#allocation3 + $0x10] sm:$0x1] %vm1347_vm6, %v3082_v0  ;;  %1350 = vst.msk [vmem:[#allocation3 + $0x20] sm:$0x1] %vm1347_vm6, %v3082_v0  ;;  %p3012_p6 = scmp.ne.s32.totalorder %s3676_s18, %s3011_s22  ;;  %p3737_p11 = scmp.ne.s32.totalorder %s3734_s13, 0 }
  0x4d   : > { %1351 = vst.msk [vmem:[#allocation3 + $0x30] sm:$0x1] %vm1347_vm6, %v3082_v0  ;;  %1352 = vst.msk [vmem:[#allocation3 + $0x40] sm:$0x1] %vm1347_vm6, %v3082_v0  ;;  %s3084_s23 = smov [#allocation7]  }
  0x4e   : > { %1353 = vst.msk [vmem:[#allocation3 + $0x50] sm:$0x1] %vm1347_vm6, %v3082_v0  ;;  %1354 = vst.msk [vmem:[#allocation3 + $0x60] sm:$0x1] %vm1347_vm6, %v3082_v0  ;;  %p3013_p12 = pnand %p3012_p6, %p3737_p11  ;;  %s3015_s29 = sshll.u32 %s3084_s23, 4  ;;  %s3016_s29 = int_to_ptr.vmem [resolvable:$false] %s3015_s29 }
  0x4f   : > { %1355 = vst.msk [vmem:[#allocation3 + $0x70] sm:$0x1] %vm1347_vm6, %v3082_v0  ;;  %1356 = vst.msk [vmem:[#allocation3 + $0x80] sm:$0x1] %vm1347_vm6, %v3082_v0  ;;  %s3017_s19 = scalar_lea.vmem %s3016_s29, 2048  ;;  %p3018_p8 = scmp.lt.s32.totalorder %s3676_s18, %s3016_s29 }
  0x50   : > { %1357 = vst.msk [vmem:[#allocation3 + $0x90] sm:$0x1] %vm1347_vm6, %v3082_v0  ;;  %1360 = vst.msk [vmem:[#allocation3 + $0x29] sm:$0x1] %vm1347_vm6, %v3082_v0  ;;  %p3014_p13 = pneg %p3013_p12  ;;  %p3019_p10 = scmp.lt.s32.totalorder %s3017_s19, %s3011_s22 }
  0x51   : > { %1361 = vst.msk [vmem:[#allocation3 + $0x39] sm:$0x1] %vm1347_vm6, %v3082_v0  ;;  %1362 = vst.msk [vmem:[#allocation3 + $0x49] sm:$0x1] %vm1347_vm6, %v3082_v0 }
  0x52   : > { %1363 = vst.msk [vmem:[#allocation3 + $0x59] sm:$0x1] %vm1347_vm6, %v3082_v0  ;;  %1364 = vst.msk [vmem:[#allocation3 + $0x69] sm:$0x1] %vm1347_vm6, %v3082_v0  ;;  %p3020_p0 = por %p3019_p10, %p3018_p8 }
  0x53   : > { %1365 = vst.msk [vmem:[#allocation3 + $0x79] sm:$0x1] %vm1347_vm6, %v3082_v0  ;;  %1366 = vst.msk [vmem:[#allocation3 + $0x89] sm:$0x1] %vm1347_vm6, %v3082_v0 }
  0x54   : > { %1358 = vst.msk [vmem:[#allocation3 + $0x9] sm:$0x1] %vm1347_vm6, %v3082_v0  ;;  %1367 = vst.msk [vmem:[#allocation3 + $0x99] sm:$0x1] %vm1347_vm6, %v3082_v0  ;;  %v2458_v0 = vld [vmem:[%s3725_s2] ss:$0 sm:$0xff]  ;;  %p3021_p2 = pnand %p3020_p0, %p3014_p13 }
  0xae   : > { %v335_v28 = vpop.permute.xlu1 %334 }
  0xaf   : > { %v356_v29 = vmax.bf16 %v335_v28, %v316_v4  ;;  %v407_v4 = vld [vmem:[#allocation2] sm:$0xff] }
  0xb0   : > { %v331_v30 = vpop.permute.xlu0 %330 }
  0xb1   : > { %v354_v31 = vmax.bf16 %v331_v30, %v314_v8  ;;  %v392_v32 = vunpack.c.l.bf16 %v356_v29 }
  0xb2   : > { %v337_v34 = vpop.permute.xlu1 %336 }
  0xb3   : > { %v390_v33 = vunpack.c.l.bf16 %v354_v31  ;;  %401 = vst.msk [vmem:[#allocation2 + $0x31] sm:$0xff] %vm362_vm0, %v392_v32  ;;  %v357_v35 = vmax.bf16 %v337_v34, %v317_v11  ;;  %v810_v34 = vsel %vm460_vm3, %v2433_v24, 0 }
  0xb4   : > { %v333_v36 = vpop.permute.xlu0 %332 }
  0xb5   : > { %399 = vst.msk [vmem:[#allocation2 + $0x11] sm:$0xff] %vm362_vm0, %v390_v33  ;;  %v355_v37 = vmax.bf16 %v333_v36, %v315_v12  ;;  %v393_v38 = vunpack.c.l.bf16 %v357_v35 }
  0xb6   : > { %v341_v40 = vpop.permute.xlu1 %340 }
  0xb7   : > { %v391_v39 = vunpack.c.l.bf16 %v355_v37  ;;  %402 = vst.msk [vmem:[#allocation2 + $0x41] sm:$0xff] %vm362_vm0, %v393_v38  ;;  %v359_v41 = vmax.bf16 %v341_v40, %v319_v19  ;;  %v2438_v37 = vld [vmem:[%s3724_s1 + $0xa] sm:$0x3] }
  0xb8   : > { %v339_v42 = vpop.permute.xlu0 %338 }
  0xb9   : > { %400 = vst.msk [vmem:[#allocation2 + $0x21] sm:$0xff] %vm362_vm0, %v391_v39  ;;  %v358_v43 = vmax.bf16 %v339_v42, %v318_v21  ;;  %v395_v44 = vunpack.c.l.bf16 %v359_v41 }
  0xba   : > { %v3323_v53 = vld [vmem:[#allocation2 + $0x32] sm:$0xff] }
  0xbb   : > { %v394_v46 = vunpack.c.l.bf16 %v358_v43  ;;  %v345_v47 = vpop.permute.xlu1 %344  ;;  %404 = vst.msk [vmem:[#allocation2 + $0x61] sm:$0xff] %vm362_vm0, %v395_v44  ;;  %v410_v10 = vld [vmem:[#allocation2 + $0x30] sm:$0xff]  ;;  %v912_v43 = vsel %vm460_vm3, %v2438_v37, 0 }
  0xbc   : > { %v361_v48 = vmax.bf16 %v345_v47, %v321_v26  ;;  %v343_v49 = vpop.permute.xlu0 %342  ;;  %v3319_v50 = vld [vmem:[#allocation2 + $0x12] sm:$0xff]  ;;  %v420_v26 = vld [vmem:[#allocation2 + $0x1] sm:$0xff] }
  0xbd   : > { %403 = vst.msk [vmem:[#allocation2 + $0x51] sm:$0xff] %vm362_vm0, %v394_v46  ;;  %v360_v51 = vmax.bf16 %v343_v49, %v320_v27  ;;  %v442_v52 = vpack.c.bf16 %v3319_v50, %v434_v45  ;;  %v408_v5 = vld [vmem:[#allocation2 + $0x10] sm:$0xff]  ;;  %v2443_v45 = vld [vmem:[%s3724_s1 + $0xc] sm:$0x3]  ;;  %v2448_v49 = vld [vmem:[%s3724_s1 + $0xe] sm:$0x3] }
  0xbe   : > { %v397_v54 = vunpack.c.l.bf16 %v361_v48  ;;  %v3326_v56 = vld [vmem:[#allocation2 + $0x42] sm:$0xff]  ;;  %v415_v8 = vpack.c.bf16 %v408_v5, %v407_v4  ;;  %v421_v27 = vld [vmem:[#allocation2 + $0x11] sm:$0xff]  ;;  %v1015_v48 = vsel %vm460_vm3, %v2443_v45, 0 }
  0xbf   : > { %v396_v55 = vunpack.c.l.bf16 %v360_v51  ;;  %2605 = vmatprep.mubr.msk.bf16.mxu0 %vm362_vm0, %v442_v52  ;;  %v894_v58 = vpack.c.bf16 %v3326_v56, %v3323_v53  ;;  %v411_v14 = vld [vmem:[#allocation2 + $0x40] sm:$0xff]  ;;  %v428_v29 = vpack.c.bf16 %v421_v27, %v420_v26  ;;  %v423_v31 = vld [vmem:[#allocation2 + $0x31] sm:$0xff]  ;;  %v1117_v52 = vsel %vm460_vm3, %v2448_v49, 0 }
  0xc0   : > { %406 = vst.msk [vmem:[#allocation2 + $0x81] sm:$0xff] %vm362_vm0, %v397_v54  ;;  %v3329_v57 = vld [vmem:[#allocation2 + $0x22] sm:$0xff]  ;;  %v618_v21 = vpack.c.bf16 %v411_v14, %v410_v10  ;;  %v995_v54 = vld [vmem:[#allocation2 + $0x90] sm:$0xff] }
  0xc1   : > { %405 = vst.msk [vmem:[#allocation2 + $0x71] sm:$0xff] %vm362_vm0, %v396_v55  ;;  %v3336_v59 = vpack.c.bf16 %v3323_v53, %v3329_v57  ;;  %v893_v62 = vpack.c.bf16 %v3329_v57, %v3319_v50  ;;  %v409_v9 = vld [vmem:[#allocation2 + $0x20] sm:$0xff]  ;;  %v2453_v53 = vld [vmem:[%s3724_s1 + $0x10] sm:$0x3] }
  0xc2   : > { %v3346_v63 = vld [vmem:[#allocation2 + $0x62] sm:$0xff]  ;;  %v3368_v12 = vpack.c.bf16 %v410_v10, %v409_v9  ;;  %v617_v20 = vpack.c.bf16 %v409_v9, %v408_v5  ;;  %v1097_v57 = vld [vmem:[#allocation2 + $0x91] sm:$0xff] }
  0xc3   : > { %2606 = vmatmul.mubr.msk.bf16.vlgmr.msra.gmra.mrb[0].mxu0 %vm362_vm0, %v3336_v59  ;;  %v413_v18 = vld [vmem:[#allocation2 + $0x60] sm:$0xff] }
  0xc4   : > { %2614 = vmatpush3.bf16.msra.mxu0 %v542_v60  ;;  %v3348_v1 = vld [vmem:[#allocation2 + $0x52] sm:$0xff]  ;;  %v422_v30 = vld [vmem:[#allocation2 + $0x21] sm:$0xff] }
  0xc5   : > { %v3352_v2 = vpack.c.bf16 %v3348_v1, %v3326_v56  ;;  %2913 = vmatprep.subr.msk.bf16.mxu0 %vm460_vm3, %v2424_v61  ;;  %v895_v3 = vpack.c.bf16 %v3346_v63, %v3348_v1  ;;  %v412_v11 = vld [vmem:[#allocation2 + $0x50] sm:$0xff]  ;;  %v429_v33 = vpack.c.bf16 %v423_v31, %v422_v30  ;;  %v424_v35 = vld [vmem:[#allocation2 + $0x41] sm:$0xff]  ;;  %v791_v41 = vpack.c.bf16 %v422_v30, %v421_v27 }
  0xc6   : > { %v3371_v15 = vpack.c.bf16 %v412_v11, %v411_v14  ;;  %v619_v23 = vpack.c.bf16 %v413_v18, %v412_v11  ;;  %v425_v32 = vld [vmem:[#allocation2 + $0x51] sm:$0xff]  ;;  %v426_v39 = vld [vmem:[#allocation2 + $0x61] sm:$0xff]  ;;  %v792_v42 = vpack.c.bf16 %v424_v35, %v423_v31  ;;  %v1219_v56 = vsel %vm460_vm3, %v2453_v53, 0 }
  0xc7   : > { %2609 = vmatprep.mubr.msk.bf16.mxu0 %vm362_vm0, %v3352_v2  ;;  %v616_v25 = vld [vmem:[#allocation2 + $0x80] sm:$0xff]  ;;  %v430_v36 = vpack.c.bf16 %v425_v32, %v424_v35  ;;  %v793_v44 = vpack.c.bf16 %v426_v39, %v425_v32  ;;  %v1199_v60 = vld [vmem:[#allocation2 + $0x92] sm:$0xff] }
  0xc8   : > { %v3359_v6 = vld [vmem:[#allocation2 + $0x72] sm:$0xff]  ;;  %v790_v46 = vld [vmem:[#allocation2 + $0x81] sm:$0xff]  ;;  %v999_v55 = vpack.c.bf16 %v995_v54, %v616_v25 }
  0xc9   : > { %v3363_v7 = vpack.c.bf16 %v3359_v6, %v3346_v63  ;;  %v414_v17 = vld [vmem:[#allocation2 + $0x70] sm:$0xff]  ;;  %v892_v50 = vld [vmem:[#allocation2 + $0x82] sm:$0xff] }
  0xca   : > { %v3381_v19 = vpack.c.bf16 %v414_v17, %v413_v18  ;;  %v620_v28 = vpack.c.bf16 %v616_v25, %v414_v17  ;;  %v427_v38 = vld [vmem:[#allocation2 + $0x71] sm:$0xff]  ;;  %v896_v51 = vpack.c.bf16 %v892_v50, %v3359_v6  ;;  %v1203_v61 = vpack.c.bf16 %v1199_v60, %v892_v50  ;;  %v1389_v63 = vld [vmem:[%s3727_s4] sm:$0xf] }
  0xcb   : > { %2610 = vmatmul.mubr.msk.bf16.gmra.mrb[4].mxu0 %vm362_vm0, %v3363_v7  ;;  %v431_v40 = vpack.c.bf16 %v427_v38, %v426_v39  ;;  %v794_v47 = vpack.c.bf16 %v790_v46, %v427_v38  ;;  %v1404_v30 = vld [vmem:[#allocation3 + $0x2] sm:$0xff] }
  0xcc   : > { %2615 = vmatprep.mubr.msk.bf16.mxu0 %vm362_vm0, %v415_v8 }
  0xd3   : > { %2616 = vmatmul.mubr.msk.bf16.vlgmr.msra.gmra.mrb[0].mxu0 %vm362_vm0, %v3368_v12 }
  0xd4   : > { %2624 = vmatpush3.bf16.msra.mxu0 %v636_v13  ;;  %2619 = vmatprep.mubr.msk.bf16.mxu0 %vm362_vm0, %v3371_v15 }
  0xd5   : > { %2914 = vmatprep.subr.msk.bf16.mxu0 %vm460_vm3, %v2414_v16 }
  0xdb   : > { %2620 = vmatmul.mubr.msk.bf16.gmra.mrb[4].mxu0 %vm362_vm0, %v3381_v19 }
  0xdc   : > { %2625 = vmatprep.mubr.msk.bf16.mxu0 %vm362_vm0, %v617_v20 }
  0xe3   : > { %2626 = vmatmul.mubr.msk.bf16.vlgmr.msra.gmra.mrb[0].mxu0 %vm362_vm0, %v618_v21 }
  0xe4   : > { %2634 = vmatpush3.bf16.msra.mxu0 %v716_v22  ;;  %2629 = vmatprep.mubr.msk.bf16.mxu0 %vm362_vm0, %v619_v23 }
  0xe5   : > { %2915 = vmatprep.subr.msk.bf16.mxu0 %vm460_vm3, %v2433_v24 }
  0xeb   : > { %2630 = vmatmul.mubr.msk.bf16.gmra.mrb[4].mxu0 %vm362_vm0, %v620_v28 }
  0xec   : > { %2635 = vmatprep.mubr.msk.bf16.mxu0 %vm362_vm0, %v428_v29 }
  0xf3   : > { %2636 = vmatmul.mubr.msk.bf16.vlgmr.msra.gmra.mrb[0].mxu0 %vm362_vm0, %v429_v33 }
  0xf4   : > { %2644 = vmatpush3.bf16.msra.mxu0 %v810_v34  ;;  %2639 = vmatprep.mubr.msk.bf16.mxu0 %vm362_vm0, %v430_v36 }
  0xf5   : > { %2916 = vmatprep.subr.msk.bf16.mxu0 %vm460_vm3, %v2438_v37 }
  0xfb   : > { %2640 = vmatmul.mubr.msk.bf16.gmra.mrb[4].mxu0 %vm362_vm0, %v431_v40 }
  0xfc   : > { %2645 = vmatprep.mubr.msk.bf16.mxu0 %vm362_vm0, %v791_v41 }
 0x103   : > { %2646 = vmatmul.mubr.msk.bf16.vlgmr.msra.gmra.mrb[0].mxu0 %vm362_vm0, %v792_v42  ;;  %v1512_v42 = vsel %vm1430_vm7, %v1389_v63, 0 }
 0x104   : > { %2654 = vmatpush3.bf16.msra.mxu0 %v912_v43  ;;  %2649 = vmatprep.mubr.msk.bf16.mxu0 %vm362_vm0, %v793_v44  ;;  %v2470_v43 = vld [vmem:[%s3727_s4 + $0xc] sm:$0xf] }
 0x105   : > { %2917 = vmatprep.subr.msk.bf16.mxu0 %vm460_vm3, %v2443_v45 }
 0x10b   : > { %2650 = vmatmul.mubr.msk.bf16.gmra.mrb[4].mxu0 %vm362_vm0, %v794_v47  ;;  %v1377_v47 = vld [vmem:[#allocation3] sm:$0xff] }
 0x10c   : > { %2655 = vmatprep.mubr.msk.bf16.mxu0 %vm362_vm0, %v893_v62 }
 0x113   : > { %2656 = vmatmul.mubr.msk.bf16.vlgmr.msra.gmra.mrb[0].mxu0 %vm362_vm0, %v894_v58  ;;  %v1101_v58 = vpack.c.bf16 %v1097_v57, %v790_v46 }
 0x114   : > { %2664 = vmatpush3.bf16.msra.mxu0 %v1015_v48  ;;  %2659 = vmatprep.mubr.msk.bf16.mxu0 %vm362_vm0, %v895_v3 }
 0x115   : > { %2918 = vmatprep.subr.msk.bf16.mxu0 %vm460_vm3, %v2448_v49 }
 0x11b   : > { %2660 = vmatmul.mubr.msk.bf16.gmra.mrb[4].mxu0 %vm362_vm0, %v896_v51 }
 0x11c   : > { %2665 = vmatprep.mubr.msk.bf16.mxu0 %vm362_vm0, %v3368_v12 }
 0x123   : > { %2666 = vmatmul.mubr.msk.bf16.vlgmr.msra.gmra.mrb[0].mxu0 %vm362_vm0, %v3371_v15 }
 0x124   : > { %2674 = vmatpush3.bf16.msra.mxu0 %v1117_v52  ;;  %2669 = vmatprep.mubr.msk.bf16.mxu0 %vm362_vm0, %v3381_v19 }
 0x125   : > { %2919 = vmatprep.subr.msk.bf16.mxu0 %vm460_vm3, %v2453_v53 }
 0x12b   : > { %2670 = vmatmul.mubr.msk.bf16.gmra.mrb[4].mxu0 %vm362_vm0, %v999_v55 }
 0x12c   : > { %2675 = vmatprep.mubr.msk.bf16.mxu0 %vm362_vm0, %v429_v33 }
 0x133   : > { %2676 = vmatmul.mubr.msk.bf16.vlgmr.msra.gmra.mrb[0].mxu0 %vm362_vm0, %v430_v36 }
 0x134   : > { %2684 = vmatpush3.bf16.msra.mxu0 %v1219_v56  ;;  %2679 = vmatprep.mubr.msk.bf16.mxu0 %vm362_vm0, %v431_v40 }
 0x13b   : > { %2680 = vmatmul.mubr.msk.bf16.gmra.mrb[4].mxu0 %vm362_vm0, %v1101_v58  ;;  %v1606_v58 = vsel %vm1430_vm7, %v2470_v43, 0 }
 0x13c   : > { %2685 = vmatprep.mubr.msk.bf16.mxu0 %vm362_vm0, %v3336_v59  ;;  %v2461_v59 = vld [vmem:[%s3727_s4 + $0x8] sm:$0xf] }
 0x13d   : > { %2920 = vmatprep.subr.msk.bf16.mxu1 %vm1430_vm7, %v2461_v59  ;;  %v1432_v62 = vsel %vm1430_vm7, %v2461_v59, 0  ;;  %v2460_v59 = vld [vmem:[%s3727_s4 + $0x4] sm:$0xf] }
 0x13e   : > { %2694 = vmatpush3.bf16.msra.mxu1 %v1432_v62 }
 0x13f   : > { %2921 = vmatprep.subr.msk.bf16.mxu1 %vm1430_vm7, %v1389_v63 }
 0x143   : > { %2686 = vmatmul.mubr.msk.bf16.vlgmr.msra.gmra.mrb[0].mxu0 %vm362_vm0, %v3352_v2  ;;  %v2459_v2 = vld [vmem:[%s3726_s3] ss:$0 sm:$0xff] }
 0x144   : > { %2689 = vmatprep.mubr.msk.bf16.mxu0 %vm362_vm0, %v3363_v7 }
 0x14b   : > { %2690 = vmatmul.mubr.msk.bf16.gmra.mrb[4].mxu0 %vm362_vm0, %v1203_v61 }
 0x216   : > { %v2687_v1 = vpop.f32.mrb[0].mxu0 }
 0x217   : > { %v1311_v3 = vmul.f32 %v2687_v1, %v2458_v0  ;;  %v1255_v4 = vpop.f32.mrb[1].mxu0 }
 0x218   : > { %v1309_v5 = vmul.f32 %v2458_v0, %v1255_v4  ;;  %v2688_v6 = vpop.f32.mrb[2].mxu0 }
 0x219   : > { %v1326_v7 = vadd.f32 %v2459_v2, %v1311_v3  ;;  %v1312_v8 = vmul.f32 %v2688_v6, %v2458_v0  ;;  %v1258_v9 = vpop.f32.mrb[3].mxu0  ;;  %v1686_v3 = vsel %vm1430_vm7, %v2460_v59, 0 }
 0x21a   : > { %v1324_v10 = vadd.f32 %v2459_v2, %v1309_v5  ;;  %v1310_v11 = vmul.f32 %v2458_v0, %v1258_v9  ;;  %v2479_v5 = vld [vmem:[%s3727_s4 + $0x10] sm:$0xf] }
 0x21b   : > { %v1334_v12 = vmax.f32 %v1326_v7, 0.0  ;;  %v1327_v13 = vadd.f32 %v2459_v2, %v1312_v8  ;;  %v1390_v7 = vld [vmem:[#allocation3 + $0x1] sm:$0xff] }
 0x21c   : > { %v1332_v14 = vmax.f32 %v1324_v10, 0.0  ;;  %v1325_v15 = vadd.f32 %v2459_v2, %v1310_v11 }
 0x21d   : > { %1371 = vst.msk [vmem:[#allocation3 + $0x31] sm:$0xff] %vm1340_vm4, %v1334_v12  ;;  %v1335_v16 = vmax.f32 %v1327_v13, 0.0 }
 0x21e   : > { %1369 = vst.msk [vmem:[#allocation3 + $0x11] sm:$0xff] %vm1340_vm4, %v1332_v14  ;;  %v1333_v17 = vmax.f32 %v1325_v15, 0.0  ;;  %v2691_v18 = vpop.f32.mrb[4].mxu0  ;;  %v1780_v15 = vsel %vm1430_vm7, %v2479_v5, 0 }
 0x21f   : > { %1372 = vst.msk [vmem:[#allocation3 + $0x41] sm:$0xff] %vm1340_vm4, %v1335_v16  ;;  %v1315_v19 = vmul.f32 %v2691_v18, %v2458_v0  ;;  %v1271_v20 = vpop.f32.mrb[5].mxu0  ;;  %v2484_v18 = vld [vmem:[%s3727_s4 + $0x14] sm:$0xf] }
 0x220   : > { %1370 = vst.msk [vmem:[#allocation3 + $0x21] sm:$0xff] %vm1340_vm4, %v1333_v17  ;;  %v1313_v21 = vmul.f32 %v2458_v0, %v1271_v20  ;;  %v2692_v22 = vpop.f32.mrb[6].mxu0 }
 0x221   : > { %v1330_v23 = vadd.f32 %v2459_v2, %v1315_v19  ;;  %v1316_v24 = vmul.f32 %v2692_v22, %v2458_v0  ;;  %v1274_v25 = vpop.f32.mrb[7].mxu0 }
 0x222   : > { %v1328_v26 = vadd.f32 %v2459_v2, %v1313_v21  ;;  %v1314_v27 = vmul.f32 %v2458_v0, %v1274_v25 }
 0x223   : > { %v1338_v28 = vmax.f32 %v1330_v23, 0.0  ;;  %v1331_v29 = vadd.f32 %v2459_v2, %v1316_v24  ;;  %v1882_v24 = vsel %vm1430_vm7, %v2484_v18, 0 }
 0x224   : > { %v1336_v31 = vmax.f32 %v1328_v26, 0.0  ;;  %v1329_v32 = vadd.f32 %v2459_v2, %v1314_v27  ;;  %v3525_v37 = vld [vmem:[#allocation3 + $0x32] sm:$0xff] }
 0x225   : > { %1375 = vst.msk [vmem:[#allocation3 + $0x71] sm:$0xff] %vm1340_vm4, %v1338_v28  ;;  %v1339_v33 = vmax.f32 %v1331_v29, 0.0  ;;  %v3521_v34 = vld [vmem:[#allocation3 + $0x12] sm:$0xff] }
 0x226   : > { %1373 = vst.msk [vmem:[#allocation3 + $0x51] sm:$0xff] %vm1340_vm4, %v1336_v31  ;;  %v1337_v35 = vmax.f32 %v1329_v32, 0.0  ;;  %v1412_v36 = vpack.c.bf16 %v3521_v34, %v1404_v30  ;;  %v3527_v38 = vld [vmem:[#allocation3 + $0x42] sm:$0xff]  ;;  %v1378_v48 = vld [vmem:[#allocation3 + $0x10] sm:$0xff]  ;;  %v2489_v26 = vld [vmem:[%s3727_s4 + $0x18] sm:$0xf] }
 0x227   : > { %1376 = vst.msk [vmem:[#allocation3 + $0x81] sm:$0xff] %vm1340_vm4, %v1339_v33  ;;  %v3530_v39 = vld [vmem:[#allocation3 + $0x22] sm:$0xff]  ;;  %v1864_v40 = vpack.c.bf16 %v3527_v38, %v3525_v37  ;;  %v1385_v52 = vpack.c.bf16 %v1378_v48, %v1377_v47  ;;  %v1380_v56 = vld [vmem:[#allocation3 + $0x30] sm:$0xff]  ;;  %v1985_v29 = vsel %vm1430_vm7, %v2489_v26, 0  ;;  %v2494_v30 = vld [vmem:[%s3727_s4 + $0x1c] sm:$0xf] }
 0x228   : > { %1374 = vst.msk [vmem:[#allocation3 + $0x61] sm:$0xff] %vm1340_vm4, %v1337_v35  ;;  %2695 = vmatprep.mubr.msk.bf16.mxu1 %vm1340_vm4, %v1412_v36  ;;  %v3538_v41 = vpack.c.bf16 %v3525_v37, %v3530_v39  ;;  %v1863_v44 = vpack.c.bf16 %v3530_v39, %v3521_v34  ;;  %v1379_v54 = vld [vmem:[#allocation3 + $0x20] sm:$0xff]  ;;  %v1391_v8 = vld [vmem:[#allocation3 + $0x11] sm:$0xff]  ;;  %v2087_v33 = vsel %vm1430_vm7, %v2494_v30, 0 }
 0x229   : > { %v3570_v57 = vpack.c.bf16 %v1380_v56, %v1379_v54  ;;  %v1381_v60 = vld [vmem:[#allocation3 + $0x40] sm:$0xff]  ;;  %v1587_v1 = vpack.c.bf16 %v1379_v54, %v1378_v48  ;;  %v1398_v10 = vpack.c.bf16 %v1391_v8, %v1390_v7  ;;  %v1393_v13 = vld [vmem:[#allocation3 + $0x31] sm:$0xff] }
 0x22a   : > { %2696 = vmatmul.mubr.msk.bf16.vlgmr.msra.gmra.mrb[0].mxu1 %vm1340_vm4, %v3538_v41  ;;  %v1588_v2 = vpack.c.bf16 %v1381_v60, %v1380_v56  ;;  %v1392_v11 = vld [vmem:[#allocation3 + $0x21] sm:$0xff]  ;;  %v1965_v35 = vld [vmem:[#allocation3 + $0x90] sm:$0xff] }
 0x22b   : > { %2704 = vmatpush3.bf16.msra.mxu1 %v1512_v42  ;;  %v1399_v14 = vpack.c.bf16 %v1393_v13, %v1392_v11  ;;  %v1394_v16 = vld [vmem:[#allocation3 + $0x41] sm:$0xff]  ;;  %v1761_v22 = vpack.c.bf16 %v1392_v11, %v1391_v8 }
 0x22c   : > { %2922 = vmatprep.subr.msk.bf16.mxu1 %vm1430_vm7, %v2470_v43  ;;  %v3557_v50 = vld [vmem:[#allocation3 + $0x72] sm:$0xff]  ;;  %v1762_v23 = vpack.c.bf16 %v1394_v16, %v1393_v13  ;;  %v2499_v34 = vld [vmem:[%s3727_s4 + $0x20] sm:$0xf] }
 0x22d   : > { %v3549_v45 = vld [vmem:[#allocation3 + $0x52] sm:$0xff]  ;;  %v2189_v37 = vsel %vm1430_vm7, %v2499_v34, 0  ;;  %v2504_v43 = vld [vmem:[%s3728_s5] ss:$0 sm:$0xff] }
 0x22e   : > { %v3553_v46 = vpack.c.bf16 %v3549_v45, %v3527_v38  ;;  %v1382_v55 = vld [vmem:[#allocation3 + $0x50] sm:$0xff]  ;;  %v1586_v6 = vld [vmem:[#allocation3 + $0x80] sm:$0xff] }
 0x22f   : > { %v3555_v49 = vld [vmem:[#allocation3 + $0x62] sm:$0xff]  ;;  %v3573_v61 = vpack.c.bf16 %v1382_v55, %v1381_v60  ;;  %v1384_v63 = vld [vmem:[#allocation3 + $0x70] sm:$0xff]  ;;  %v1969_v36 = vpack.c.bf16 %v1965_v35, %v1586_v6 }
 0x230   : > { %2699 = vmatprep.mubr.msk.bf16.mxu1 %vm1340_vm4, %v3553_v46  ;;  %v3563_v51 = vpack.c.bf16 %v3557_v50, %v3555_v49  ;;  %v1865_v53 = vpack.c.bf16 %v3555_v49, %v3549_v45  ;;  %v1383_v62 = vld [vmem:[#allocation3 + $0x60] sm:$0xff]  ;;  %v1590_v9 = vpack.c.bf16 %v1586_v6, %v1384_v63  ;;  %v1395_v12 = vld [vmem:[#allocation3 + $0x51] sm:$0xff] }
 0x231   : > { %v3583_v0 = vpack.c.bf16 %v1384_v63, %v1383_v62  ;;  %v1589_v4 = vpack.c.bf16 %v1383_v62, %v1382_v55  ;;  %v1400_v17 = vpack.c.bf16 %v1395_v12, %v1394_v16  ;;  %v1396_v19 = vld [vmem:[#allocation3 + $0x61] sm:$0xff]  ;;  %v1397_v20 = vld [vmem:[#allocation3 + $0x71] sm:$0xff] }
 0x232   : > { %2700 = vmatmul.mubr.msk.bf16.gmra.mrb[4].mxu1 %vm1340_vm4, %v3563_v51  ;;  %v1401_v21 = vpack.c.bf16 %v1397_v20, %v1396_v19  ;;  %v1763_v25 = vpack.c.bf16 %v1396_v19, %v1395_v12  ;;  %v1760_v27 = vld [vmem:[#allocation3 + $0x81] sm:$0xff]  ;;  %v2067_v38 = vld [vmem:[#allocation3 + $0x91] sm:$0xff] }
 0x233   : > { %2705 = vmatprep.mubr.msk.bf16.mxu1 %vm1340_vm4, %v1385_v52  ;;  %v1764_v28 = vpack.c.bf16 %v1760_v27, %v1397_v20  ;;  %v1862_v31 = vld [vmem:[#allocation3 + $0x82] sm:$0xff]  ;;  %v2071_v39 = vpack.c.bf16 %v2067_v38, %v1760_v27 }
 0x234   : > { %v1866_v32 = vpack.c.bf16 %v1862_v31, %v3557_v50 }
 0x23a   : > { %2706 = vmatmul.mubr.msk.bf16.vlgmr.msra.gmra.mrb[0].mxu1 %vm1340_vm4, %v3570_v57 }
 0x23b   : > { %2714 = vmatpush3.bf16.msra.mxu1 %v1606_v58  ;;  %2709 = vmatprep.mubr.msk.bf16.mxu1 %vm1340_vm4, %v3573_v61 }
 0x23c   : > { %2923 = vmatprep.subr.msk.bf16.mxu1 %vm1430_vm7, %v2460_v59 }
 0x242   : > { %2710 = vmatmul.mubr.msk.bf16.gmra.mrb[4].mxu1 %vm1340_vm4, %v3583_v0 }
 0x243   : > { %2715 = vmatprep.mubr.msk.bf16.mxu1 %vm1340_vm4, %v1587_v1 }
 0x24a   : > { %2716 = vmatmul.mubr.msk.bf16.vlgmr.msra.gmra.mrb[0].mxu1 %vm1340_vm4, %v1588_v2 }
 0x24b   : > { %2724 = vmatpush3.bf16.msra.mxu1 %v1686_v3  ;;  %2719 = vmatprep.mubr.msk.bf16.mxu1 %vm1340_vm4, %v1589_v4 }
 0x24c   : > { %2924 = vmatprep.subr.msk.bf16.mxu1 %vm1430_vm7, %v2479_v5 }
 0x252   : > { %2720 = vmatmul.mubr.msk.bf16.gmra.mrb[4].mxu1 %vm1340_vm4, %v1590_v9 }
 0x253   : > { %2725 = vmatprep.mubr.msk.bf16.mxu1 %vm1340_vm4, %v1398_v10 }
 0x25a   : > { %2726 = vmatmul.mubr.msk.bf16.vlgmr.msra.gmra.mrb[0].mxu1 %vm1340_vm4, %v1399_v14 }
 0x25b   : > { %2734 = vmatpush3.bf16.msra.mxu1 %v1780_v15  ;;  %2729 = vmatprep.mubr.msk.bf16.mxu1 %vm1340_vm4, %v1400_v17 }
 0x25c   : > { %2925 = vmatprep.subr.msk.bf16.mxu1 %vm1430_vm7, %v2484_v18 }
 0x262   : > { %2730 = vmatmul.mubr.msk.bf16.gmra.mrb[4].mxu1 %vm1340_vm4, %v1401_v21 }
 0x263   : > { %2735 = vmatprep.mubr.msk.bf16.mxu1 %vm1340_vm4, %v1761_v22 }
 0x26a   : > { %2736 = vmatmul.mubr.msk.bf16.vlgmr.msra.gmra.mrb[0].mxu1 %vm1340_vm4, %v1762_v23 }
 0x26b   : > { %2744 = vmatpush3.bf16.msra.mxu1 %v1882_v24  ;;  %2739 = vmatprep.mubr.msk.bf16.mxu1 %vm1340_vm4, %v1763_v25 }
 0x26c   : > { %2926 = vmatprep.subr.msk.bf16.mxu1 %vm1430_vm7, %v2489_v26 }
 0x272   : > { %2740 = vmatmul.mubr.msk.bf16.gmra.mrb[4].mxu1 %vm1340_vm4, %v1764_v28 }
 0x273   : > { %2745 = vmatprep.mubr.msk.bf16.mxu1 %vm1340_vm4, %v1863_v44 }
 0x27a   : > { %2746 = vmatmul.mubr.msk.bf16.vlgmr.msra.gmra.mrb[0].mxu1 %vm1340_vm4, %v1864_v40  ;;  %v2169_v40 = vld [vmem:[#allocation3 + $0x92] sm:$0xff] }
 0x27b   : > { %2754 = vmatpush3.bf16.msra.mxu1 %v1985_v29  ;;  %2749 = vmatprep.mubr.msk.bf16.mxu1 %vm1340_vm4, %v1865_v53  ;;  %v2173_v42 = vpack.c.bf16 %v2169_v40, %v1862_v31 }
 0x27c   : > { %2927 = vmatprep.subr.msk.bf16.mxu1 %vm1430_vm7, %v2494_v30 }
 0x282   : > { %2750 = vmatmul.mubr.msk.bf16.gmra.mrb[4].mxu1 %vm1340_vm4, %v1866_v32 }
 0x283   : > { %2755 = vmatprep.mubr.msk.bf16.mxu1 %vm1340_vm4, %v3570_v57 }
 0x28a   : > { %2756 = vmatmul.mubr.msk.bf16.vlgmr.msra.gmra.mrb[0].mxu1 %vm1340_vm4, %v3573_v61 }
 0x28b   : > { %2764 = vmatpush3.bf16.msra.mxu1 %v2087_v33  ;;  %2759 = vmatprep.mubr.msk.bf16.mxu1 %vm1340_vm4, %v3583_v0 }
 0x28c   : > { %2928 = vmatprep.subr.msk.bf16.mxu1 %vm1430_vm7, %v2499_v34 }
 0x292   : > { %2760 = vmatmul.mubr.msk.bf16.gmra.mrb[4].mxu1 %vm1340_vm4, %v1969_v36 }
 0x293   : > { %2765 = vmatprep.mubr.msk.bf16.mxu1 %vm1340_vm4, %v1399_v14 }
 0x29a   : > { %2766 = vmatmul.mubr.msk.bf16.vlgmr.msra.gmra.mrb[0].mxu1 %vm1340_vm4, %v1400_v17 }
 0x29b   : > { %2774 = vmatpush3.bf16.msra.mxu1 %v2189_v37  ;;  %2769 = vmatprep.mubr.msk.bf16.mxu1 %vm1340_vm4, %v1401_v21 }
 0x2a2   : > { %2770 = vmatmul.mubr.msk.bf16.gmra.mrb[4].mxu1 %vm1340_vm4, %v2071_v39 }
 0x2a3   : > { %2775 = vmatprep.mubr.msk.bf16.mxu1 %vm1340_vm4, %v3538_v41  ;;  %v2505_v41 = vld [vmem:[%s3729_s6] ss:$0 sm:$0xff] }
 0x2aa   : > { %2776 = vmatmul.mubr.msk.bf16.vlgmr.msra.gmra.mrb[0].mxu1 %vm1340_vm4, %v3553_v46 }
 0x2ab   : > { %2779 = vmatprep.mubr.msk.bf16.mxu1 %vm1340_vm4, %v3563_v51 }
 0x2b2   : > { %2780 = vmatmul.mubr.msk.bf16.gmra.mrb[4].mxu1 %vm1340_vm4, %v2173_v42 }
 0x37d   : > { %v2777_v44 = vpop.f32.mrb[0].mxu1 }
 0x37e   : > { %v2281_v45 = vmul.f32 %v2777_v44, %v2504_v43  ;;  %v2225_v47 = vpop.f32.mrb[1].mxu1 }
 0x37f   : > { %v2279_v46 = vmul.f32 %v2504_v43, %v2225_v47  ;;  %v2778_v48 = vpop.f32.mrb[2].mxu1 }
 0x380   : > { %v2296_v49 = vadd.f32 %v2505_v41, %v2281_v45  ;;  %v2282_v50 = vmul.f32 %v2778_v48, %v2504_v43  ;;  %v2228_v51 = vpop.f32.mrb[3].mxu1 }
 0x381   : > { %v2294_v52 = vadd.f32 %v2505_v41, %v2279_v46  ;;  %v2280_v53 = vmul.f32 %v2504_v43, %v2228_v51 }
 0x382   : > { %v2304_v54 = vmax.f32 %v2296_v49, 0.0  ;;  %v2297_v55 = vadd.f32 %v2505_v41, %v2282_v50 }
 0x383   : > { %v2302_v56 = vmax.f32 %v2294_v52, 0.0  ;;  %v2295_v57 = vadd.f32 %v2505_v41, %v2280_v53 }
 0x384   : > { %2312 = vst.msk [vmem:[%s296_s11 + $0x10] sm:$0xff] %vm1340_vm4, %v2304_v54  ;;  %v2305_v58 = vmax.f32 %v2297_v55, 0.0 }
 0x385   : > { %2310 = vst.msk [vmem:[%s296_s11] sm:$0xff] %vm1340_vm4, %v2302_v56  ;;  %v2303_v60 = vmax.f32 %v2295_v57, 0.0  ;;  %v2781_v61 = vpop.f32.mrb[4].mxu1 }
 0x386   : > { %2313 = vst.msk [vmem:[%s296_s11 + $0x18] sm:$0xff] %vm1340_vm4, %v2305_v58  ;;  %v2285_v59 = vmul.f32 %v2781_v61, %v2504_v43  ;;  %v2241_v62 = vpop.f32.mrb[5].mxu1 }
 0x387   : > { %2311 = vst.msk [vmem:[%s296_s11 + $0x8] sm:$0xff] %vm1340_vm4, %v2303_v60  ;;  %v2283_v63 = vmul.f32 %v2504_v43, %v2241_v62  ;;  %v2782_v0 = vpop.f32.mrb[6].mxu1 }
 0x388   : > { %v2300_v1 = vadd.f32 %v2505_v41, %v2285_v59  ;;  %v2286_v2 = vmul.f32 %v2782_v0, %v2504_v43  ;;  %v2244_v3 = vpop.f32.mrb[7].mxu1 }
 0x389   : > { %v2298_v4 = vadd.f32 %v2505_v41, %v2283_v63  ;;  %v2284_v5 = vmul.f32 %v2504_v43, %v2244_v3 }
 0x38a   : > { %v2308_v6 = vmax.f32 %v2300_v1, 0.0  ;;  %v2301_v7 = vadd.f32 %v2505_v41, %v2286_v2 }
 0x38b   : > { %v2306_v8 = vmax.f32 %v2298_v4, 0.0  ;;  %v2299_v9 = vadd.f32 %v2505_v41, %v2284_v5 }
 0x38c   : > { %2316 = vst.msk [vmem:[%s296_s11 + $0x30] sm:$0xff] %vm1340_vm4, %v2308_v6  ;;  %v2309_v10 = vmax.f32 %v2301_v7, 0.0 }
 0x38d   : > { %2314 = vst.msk [vmem:[%s296_s11 + $0x20] sm:$0xff] %vm1340_vm4, %v2306_v8  ;;  %v2307_v11 = vmax.f32 %v2299_v9, 0.0 }
 0x38e   : > { %2317 = vst.msk [vmem:[%s296_s11 + $0x38] sm:$0xff] %vm1340_vm4, %v2309_v10 }
 0x38f   : > { %2315 = vst.msk [vmem:[%s296_s11 + $0x28] sm:$0xff] %vm1340_vm4, %v2307_v11 }
 0x390   : > { %3024 = shalt.err (!%p3021_p2)
}
 0x391   : > { %s3025_s21 = scalar_lea.hbm %s3674_s20, 1024  ;;  %s3029_s11 = scalar_lea.hbm %s3730_s7, 2048 }
 0x392   : > { %p3026_p4 = scmp.ne.s32.totalorder %s3674_s20, %s3025_s21  ;;  %p3030_p9 = scmp.lt.u32.totalorder %s3674_s20, %s3730_s7 }
 0x393   : > { %p3031_p1 = scmp.lt.u32.totalorder %s3029_s11, %s3025_s21  ;;  %p3033_p6 = scmp.lt.u32.totalorder %s3025_s21, %s3674_s20 }
 0x394   : > { %p3027_p5 = pnand %p3026_p4, %p3737_p11 }
 0x395   : > { %p3032_p3 = por %p3031_p1, %p3030_p9 }
 0x396   : > { %p3028_p7 = pneg %p3027_p5 }
 0x397   : > { %p3034_p12 = por %p3033_p6, %p3032_p3 }
 0x399   : > { %p3035_p13 = pnand %p3034_p12, %p3028_p7 }
 0x39b   : > { %3038 = shalt.err (!%p3035_p13)
}
 0x39c   : > { %s3085_s12 = smov 128   ;;  %s3086_s22 = smov 8  }
 0x39d   : > { %2931 = dma.vmem_to_hbm [thread:$0]  (%p3737_p11), %s3676_s18, 1024, %s3674_s20, %s2319_s28, %s3085_s12, %s3085_s12, %s3086_s22  }
 0x39e PF: > { %s2347_s23 = sand.u32 1, %s3065_s24   ;;  %p3738_p8 = scmp.ne.s32.totalorder %s3735_s14, 0 }
 0x39f   : > { %p3739_p10 = scmp.ge.s32.totalorder %s3077_s27, 2  ;;  %s2348_s29 = scalar_lea.sflag [#allocation6], %s2347_s23 }
 0x3a1   : > { %p2938_p0 = pnand %p3739_p10, %p3738_p8 }
 0x3a3   : > { %3060 = dma.done.wait (!%p2938_p0), %s2348_s29, 1024  }
 0x3a4   : > { %3062 = vsyncadd (!%p2938_p0), %s2348_s29, 4294966272  ;;  %p20_p2 = scmp.ge.s32.totalorder %s3152_s30, 4   ;;  %s3740_s24 = smov %s3069_s25 }
 0x3a5   : > { %s3741_s25 = smov %s3073_s26  ;;  %s3742_s26 = smov %s3164_s10 }
 0x3a6   : > { %s3743_s27 = smov %s3152_s30  ;;  %22 = sbr.rel (!%p20_p2) target bundleno = 5 (0x5), region = 115 }
 0x3ad   :  { %2353 = vsyncpa [#allocation5], 1 }
 0x3ae   :  { %2355 = vsyncpa [#allocation5 + $0x1], 1 }
 0x3af   :  { %2356 = vsyncpa [#allocation6], 1 }
 0x3b0   :  { %2358 = vsyncpa [#allocation6 + $0x1], 1 }

</bundles_post_ra>
